<compile_context>
chip_gen: v5e
topology: v5e:2x2
jax: 0.10.0
libtpu: 0.0.40
codegen_flags: <defaults>
</compile_context>

<pallas_src>
import math
import functools

import jax
import jax.numpy as jnp
import numpy as np
from jax.experimental import pallas as pl
from jax.experimental.pallas import tpu as pltpu


# ----------------------------- helpers ---------------------------------------

def _round_up(x, m):
    return ((x + m - 1) // m) * m


def _pad_heads_cols(w, H, D, Dp):
    """Pad the output(column)-side per-head dim: (..., H*D) -> (..., H*Dp), zeros."""
    lead = w.shape[:-1]
    w = w.reshape(*lead, H, D)
    w = jnp.pad(w, [(0, 0)] * len(lead) + [(0, 0), (0, Dp - D)])
    return w.reshape(*lead, H * Dp)


def _pad_heads_rows(w, H, D, Dp):
    """Pad the input(row)-side per-head dim: (H*D, C) -> (H*Dp, C), zeros."""
    C = w.shape[-1]
    w = w.reshape(H, D, C)
    w = jnp.pad(w, [(0, 0), (0, Dp - D), (0, 0)])
    return w.reshape(H * Dp, C)


# ----------------------------- kernel -----------------------------------------

def _attention_core(qp, kp, vp, mask, nb, L, H, D, Dp, cdt):
    """Multi-head attention on head-padded (nb*L, H*Dp) activations.

    Batch and heads are folded into ONE dot_general batch dim; Lk stays on the
    lane (minor) axis of the scores.  Padded head lanes are exact zeros, so the
    Dp-wide contraction equals the true D-wide one (no sub-tile [:, :E] slice).
    """
    scale = 1.0 / math.sqrt(D)

    def split_heads(x):                       # (nb*L, H*Dp) -> (nb*H, L, Dp)
        x4 = x.reshape(nb, L, H, Dp)
        x4 = jnp.transpose(x4, (0, 2, 1, 3))
        return x4.reshape(nb * H, L, Dp)

    qh = split_heads(qp * scale).astype(cdt)  # scale q (PyTorch convention)
    kh = split_heads(kp).astype(cdt)
    vh = split_heads(vp).astype(cdt)

    # scores: (nb*H, Lq, Lk), contraction over Dp (padded lanes contribute 0)
    s = jnp.einsum('bqd,bkd->bqk', qh, kh, preferred_element_type=jnp.float32)
    s = s + mask[None, :, :]
    s = s - jnp.max(s, axis=-1, keepdims=True)
    p = jnp.exp(s)

    denom = jnp.sum(p, axis=-1, keepdims=True)
    inv = pl.reciprocal(denom, approx=True)   # EUP slot
    inv = inv * (2.0 - denom * inv)           # one Newton step -> ~f32 accuracy
    p = p * inv

    o = jnp.einsum('bqk,bkd->bqd', p.astype(cdt), vh,
                   preferred_element_type=jnp.float32)
    o4 = o.reshape(nb, H, L, Dp)
    o4 = jnp.transpose(o4, (0, 2, 1, 3))      # -> (nb, L, H, Dp)
    return o4.reshape(nb * L, H * Dp)         # padded head lanes remain exact 0


def _info_collect_kernel(tgt_ref, pos_ref, mask_ref,
                         w_qk1_ref, b_qk1_ref,     # [Wq1 | Wk1]       (E, 2P)
                         w_tkv_ref, b_tkv_ref,     # [Wv1 | Wk2 | Wv2] (E, 3P)
                         w_o1q2_ref, b_o1q2_ref,   # Wo1 @ Wq2 fused   (P, P)
                         w_o2_ref, b_o2_ref,       # layer-2 out proj  (P, 128k)
                         out_ref, *, n_heads, head_dim, head_dim_padded,
                         compute_dtype):
    L = mask_ref.shape[0]
    R, E = tgt_ref.shape                       # R = batch_per_block * L
    nb = R // L
    P = n_heads * head_dim_padded
    cdt = compute_dtype

    x = tgt_ref[...].astype(jnp.float32)       # tgt        (R, E)
    qk = x + pos_ref[...].astype(jnp.float32)  # tgt + pos  (R, E)
    mask = mask_ref[...].astype(jnp.float32)   # additive   (L, L)

    # ---- fused wide input projections (MXU), 128-aligned segments -----------
    qk_p = jnp.dot(qk.astype(cdt), w_qk1_ref[...],
                   preferred_element_type=jnp.float32) + b_qk1_ref[...]
    t_p = jnp.dot(x.astype(cdt), w_tkv_ref[...],
                  preferred_element_type=jnp.float32) + b_tkv_ref[...]

    q1 = qk_p[:, :P]                 # tile-aligned slices (offsets 0, P, 2P)
    k1 = qk_p[:, P:]
    v1 = t_p[:, :P]
    k2 = t_p[:, P:2 * P]
    v2 = t_p[:, 2 * P:]

    # ---- layer 1: self_attn_cross(q=tgt+pos, k=tgt+pos, v=tgt) --------------
    attn1 = _attention_core(q1, k1, v1, mask, nb, L,
                            n_heads, head_dim, head_dim_padded, cdt)
    # out_proj1 fused with q_proj2 (tgt_cross only feeds layer-2 Q)
    q2 = jnp.dot(attn1.astype(cdt), w_o1q2_ref[...],
                 preferred_element_type=jnp.float32) + b_o1q2_ref[...]

    # ---- layer 2: self_attn(q=tgt_cross, k=tgt, v=tgt) ----------------------
    attn2 = _attention_core(q2, k2, v2, mask, nb, L,
                            n_heads, head_dim, head_dim_padded, cdt)
    out = jnp.dot(attn2.astype(cdt), w_o2_ref[...],
                  preferred_element_type=jnp.float32) + b_o2_ref[...]

    out_ref[...] = out.astype(out_ref.dtype)   # (R, 128) lane-dense store


# ----------------------------- packing (do once at init) ---------------------

def pack_info_collect_params(cross_params, self_params, n_heads,
                             compute_dtype=jnp.float32, lane=128):
    """Pack/pad the two nn.MultiheadAttention parameter sets for the kernel."""
    wq1, wk1, wv1, bq1, bk1, bv1, wo1, bo1 = cross_params  # self_attn_cross
    wq2, wk2, wv2, bq2, bk2, bv2, wo2, bo2 = self_params   # self_attn
    E = wq1.shape[0]
    H = n_heads
    D = E // H

    # per-head padded width so every packed segment is a multiple of 128 lanes
    P = _round_up(E, lane)
    while P % H != 0:
        P += lane
    Dp = P // H

    pc = lambda w: _pad_heads_cols(w, H, D, Dp)

    w_qk1 = jnp.concatenate([pc(wq1), pc(wk1)], axis=1)              # (E, 2P)
    b_qk1 = jnp.concatenate([pc(bq1), pc(bk1)], axis=1)              # (1, 2P)
    w_tkv = jnp.concatenate([pc(wv1), pc(wk2), pc(wv2)], axis=1)     # (E, 3P)
    b_tkv = jnp.concatenate([pc(bv1), pc(bk2), pc(bv2)], axis=1)     # (1, 3P)

    # fuse layer-1 out proj with layer-2 q proj (both W^T form: y = x @ W^T)
    w_o1q2 = wo1 @ wq2                                               # (E, E)
    b_o1q2 = bo1 @ wq2 + bq2                                         # (1, E)
    w_o1q2 = pc(_pad_heads_rows(w_o1q2, H, D, Dp))                   # (P, P)
    b_o1q2 = pc(b_o1q2)                                              # (1, P)

    # final out proj: rows head-padded, columns end-padded -> lane-dense output
    Pout = _round_up(E, lane)
    w_o2 = jnp.pad(_pad_heads_rows(wo2, H, D, Dp), ((0, 0), (0, Pout - E)))
    b_o2 = jnp.pad(bo2, ((0, 0), (0, Pout - E)))

    cdt = compute_dtype
    return dict(
        w_qk1=w_qk1.astype(cdt), b_qk1=b_qk1,
        w_tkv=w_tkv.astype(cdt), b_tkv=b_tkv,
        w_o1q2=w_o1q2.astype(cdt), b_o1q2=b_o1q2,
        w_o2=w_o2.astype(cdt), b_o2=b_o2,
        n_heads=H, head_dim=D, head_dim_padded=Dp,
        embed_dim=E, out_padded=Pout, compute_dtype=cdt,
    )


# ----------------------------- wrapper ----------------------------------------

def info_collect_layer(tgt, tgt_query_pos, self_attn_mask, packed, *,
                       batch_blocks=1):
    """Pallas implementation of InfoCollectLayer.forward (inference).

    batch_blocks=1 folds the whole batch into one grid step (best on single-TC
    v5e/v6e); set batch_blocks=2 on v7x to keep both TensorCores busy.
    """
    L, N, E = tgt.shape
    assert E == packed["embed_dim"]
    assert N % batch_blocks == 0
    if tgt_query_pos is None:
        tgt_query_pos = jnp.zeros_like(tgt)

    H, D, Dp = packed["n_heads"], packed["head_dim"], packed["head_dim_padded"]
    Pout = packed["out_padded"]
    cdt = packed["compute_dtype"]
    rows_per_block = (N // batch_blocks) * L

    # batch-major, flattened (N*L, E): contiguous per-batch row slabs
    tgt2d = jnp.transpose(tgt, (1, 0, 2)).reshape(N * L, E)
    pos2d = jnp.transpose(tgt_query_pos, (1, 0, 2)).reshape(N * L, E)

    kernel = functools.partial(_info_collect_kernel, n_heads=H, head_dim=D,
                               head_dim_padded=Dp, compute_dtype=cdt)

    row_spec = pl.BlockSpec((rows_per_block, E), lambda b: (b, 0))
    const = lambda arr: pl.BlockSpec(arr.shape, lambda b: (0,) * arr.ndim)

    out2d = pl.pallas_call(
        kernel,
        out_shape=jax.ShapeDtypeStruct((N * L, Pout), tgt.dtype),
        grid=(batch_blocks,),
        in_specs=[row_spec, row_spec, const(self_attn_mask),
                  const(packed["w_qk1"]), const(packed["b_qk1"]),
                  const(packed["w_tkv"]), const(packed["b_tkv"]),
                  const(packed["w_o1q2"]), const(packed["b_o1q2"]),
                  const(packed["w_o2"]), const(packed["b_o2"])],
        out_specs=pl.BlockSpec((rows_per_block, Pout), lambda b: (b, 0)),
        compiler_params=pltpu.CompilerParams(
            dimension_semantics=("parallel",)),
    )(tgt2d, pos2d, self_attn_mask,
      packed["w_qk1"], packed["b_qk1"], packed["w_tkv"], packed["b_tkv"],
      packed["w_o1q2"], packed["b_o1q2"], packed["w_o2"], packed["b_o2"])

    # back to PyTorch's seq-first (L, N, E)
    return jnp.transpose(out2d.reshape(N, L, Pout)[:, :, :E], (1, 0, 2))


# ---------------- pure-JAX reference (for correctness check) -----------------

def _mha_ref(q, k, v, mask, params, n_heads):
    wq_t, wk_t, wv_t, bq, bk, bv, wo_t, bo = params
    L, N, E = q.shape
    D = E // n_heads
    qp = jnp.einsum('lne,ef->lnf', q, wq_t) + bq[0]
    kp = jnp.einsum('lne,ef->lnf', k, wk_t) + bk[0]
    vp = jnp.einsum('lne,ef->lnf', v, wv_t) + bv[0]
    qh = qp.reshape(L, N, n_heads, D)
    kh = kp.reshape(L, N, n_heads, D)
    vh = vp.reshape(L, N, n_heads, D)
    s = jnp.einsum('qnhd,knhd->nhqk', qh, kh) / math.sqrt(D) + mask
    p = jax.nn.softmax(s, axis=-1)
    o = jnp.einsum('nhqk,knhd->qnhd', p, vh).reshape(L, N, E)
    return jnp.einsum('lne,ef->lnf', o, wo_t) + bo[0]


def _info_collect_ref(tgt, pos, mask, cross_params, self_params, n_heads):
    qk = tgt + pos
    tgt_cross = _mha_ref(qk, qk, tgt, mask, cross_params, n_heads)
    return _mha_ref(tgt_cross, tgt, tgt, mask, self_params, n_heads)


# ---------------- deterministic parameter init (synthetic weights) -----------

def init_mha_params(key, E):
    """Mirrors nn.MultiheadAttention params, returned pre-transposed (x @ W^T)."""
    ks = jax.random.split(key, 4)
    in_w = jax.random.normal(ks[0], (3 * E, E), jnp.float32) * (1.0 / math.sqrt(E))
    in_b = jax.random.normal(ks[1], (3 * E,), jnp.float32) * 0.02
    out_w = jax.random.normal(ks[2], (E, E), jnp.float32) * (1.0 / math.sqrt(E))
    out_b = jax.random.normal(ks[3], (E,), jnp.float32) * 0.02
    wq, wk, wv = in_w[:E], in_w[E:2 * E], in_w[2 * E:]
    bq, bk, bv = in_b[:E], in_b[E:2 * E], in_b[2 * E:]
    return (wq.T, wk.T, wv.T,
            bq.reshape(1, E), bk.reshape(1, E), bv.reshape(1, E),
            out_w.T, out_b.reshape(1, E))


if __name__ == "__main__":
    d_model = 32     # E
    n_heads = 4
    L = 8            # number of queries / seq length
    N = 2            # batch

    root = jax.random.PRNGKey(0)
    k_tgt, k_pos, k_mask, k_cross, k_self = jax.random.split(root, 5)

    tgt = jax.random.normal(k_tgt, (L, N, d_model), jnp.float32)
    tgt_query_pos = jax.random.normal(k_pos, (L, N, d_model), jnp.float32)
    self_attn_mask = 0.5 * jax.random.normal(k_mask, (L, L), jnp.float32)

    cross_params = init_mha_params(k_cross, d_model)  # self_attn_cross
    self_params = init_mha_params(k_self, d_model)    # self_attn

    ref = _info_collect_ref(tgt, tgt_query_pos, self_attn_mask,
                            cross_params, self_params, n_heads)

    # f32 path — packed once, batch fully folded into one grid step
    packed_f32 = pack_info_collect_params(cross_params, self_params, n_heads)
    out = info_collect_layer(tgt, tgt_query_pos, self_attn_mask, packed_f32)
    out = jax.block_until_ready(out)
    np.testing.assert_allclose(np.asarray(out), np.asarray(ref),
                               rtol=5e-4, atol=5e-4)

    # bf16 MXU fast path: bf16 matmul inputs, f32 accumulation + softmax math
    packed_bf16 = pack_info_collect_params(cross_params, self_params, n_heads,
                                           compute_dtype=jnp.bfloat16)
    out_bf16 = info_collect_layer(tgt, tgt_query_pos, self_attn_mask, packed_bf16)
    out_bf16 = jax.block_until_ready(out_bf16)
    np.testing.assert_allclose(np.asarray(out_bf16), np.asarray(ref),
                               rtol=5e-2, atol=5e-2)

    # v7x-style 2-way parallel split over the batch (also works on 1-TC chips)
    out_split = info_collect_layer(tgt, tgt_query_pos, self_attn_mask,
                                   packed_f32, batch_blocks=2)
    out_split = jax.block_until_ready(out_split)
    np.testing.assert_allclose(np.asarray(out_split), np.asarray(ref),
                               rtol=5e-4, atol=5e-4)

    print("KERNEL_OK")
</pallas_src>

<mosaic_0001>
module attributes {stable_mosaic.version = 11 : i64} {
  func.func @_info_collect_kernel(%arg0: i32, %arg1: memref<16x32xf32, #tpu.memory_space<vmem>>, %arg2: memref<16x32xf32, #tpu.memory_space<vmem>>, %arg3: memref<8x8xf32, #tpu.memory_space<vmem>>, %arg4: memref<32x256xf32, #tpu.memory_space<vmem>>, %arg5: memref<1x256xf32, #tpu.memory_space<vmem>>, %arg6: memref<32x384xf32, #tpu.memory_space<vmem>>, %arg7: memref<1x384xf32, #tpu.memory_space<vmem>>, %arg8: memref<128x128xf32, #tpu.memory_space<vmem>>, %arg9: memref<1x128xf32, #tpu.memory_space<vmem>>, %arg10: memref<128x128xf32, #tpu.memory_space<vmem>>, %arg11: memref<1x128xf32, #tpu.memory_space<vmem>>, %arg12: memref<16x128xf32, #tpu.memory_space<vmem>>) attributes {dimension_semantics = [#tpu.dimension_semantics<parallel>], iteration_bounds = array<i64: 1>, scalar_prefetch = 0 : i64, scratch_operands = 0 : i64, tpu.core_type = #tpu.core_type<tc>, window_params = [{transform_indices = @transform_0, window_bounds = array<i64: 16, 32>}, {transform_indices = @transform_1, window_bounds = array<i64: 16, 32>}, {pipeline_mode = #tpu.pipeline_mode<synchronous>, transform_indices = @transform_2, window_bounds = array<i64: 8, 8>}, {pipeline_mode = #tpu.pipeline_mode<synchronous>, transform_indices = @transform_3, window_bounds = array<i64: 32, 256>}, {pipeline_mode = #tpu.pipeline_mode<synchronous>, transform_indices = @transform_4, window_bounds = array<i64: 1, 256>}, {pipeline_mode = #tpu.pipeline_mode<synchronous>, transform_indices = @transform_5, window_bounds = array<i64: 32, 384>}, {pipeline_mode = #tpu.pipeline_mode<synchronous>, transform_indices = @transform_6, window_bounds = array<i64: 1, 384>}, {pipeline_mode = #tpu.pipeline_mode<synchronous>, transform_indices = @transform_7, window_bounds = array<i64: 128, 128>}, {pipeline_mode = #tpu.pipeline_mode<synchronous>, transform_indices = @transform_8, window_bounds = array<i64: 1, 128>}, {pipeline_mode = #tpu.pipeline_mode<synchronous>, transform_indices = @transform_9, window_bounds = array<i64: 128, 128>}, {pipeline_mode = #tpu.pipeline_mode<synchronous>, transform_indices = @transform_10, window_bounds = array<i64: 1, 128>}, {transform_indices = @transform_11, window_bounds = array<i64: 16, 128>}]} {
    %c0 = arith.constant 0 : index
    %c0_0 = arith.constant 0 : index
    %0 = vector.load %arg1[%c0, %c0_0] : memref<16x32xf32, #tpu.memory_space<vmem>>, vector<16x32xf32>
    %c0_1 = arith.constant 0 : index
    %c0_2 = arith.constant 0 : index
    %1 = vector.load %arg2[%c0_1, %c0_2] : memref<16x32xf32, #tpu.memory_space<vmem>>, vector<16x32xf32>
    %2 = arith.addf %0, %1 : vector<16x32xf32>
    %c0_3 = arith.constant 0 : index
    %c0_4 = arith.constant 0 : index
    %3 = vector.load %arg3[%c0_3, %c0_4] : memref<8x8xf32, #tpu.memory_space<vmem>>, vector<8x8xf32>
    %c0_5 = arith.constant 0 : index
    %c0_6 = arith.constant 0 : index
    %4 = vector.load %arg4[%c0_5, %c0_6] : memref<32x256xf32, #tpu.memory_space<vmem>>, vector<32x256xf32>
    %cst = arith.constant dense<0.000000e+00> : vector<16x256xf32>
    %5 = tpu.matmul %2, %4, %cst {dimension_numbers = #tpu.dot_dimension_numbers<[1], [0], [0], [1], [0, 0, 1, 1], [], []>} : vector<16x32xf32>, vector<32x256xf32>, vector<16x256xf32> -> vector<16x256xf32>
    %c0_7 = arith.constant 0 : index
    %c0_8 = arith.constant 0 : index
    %6 = vector.load %arg5[%c0_7, %c0_8] : memref<1x256xf32, #tpu.memory_space<vmem>>, vector<1x256xf32>
    %7 = vector.broadcast %6 : vector<1x256xf32> to vector<16x256xf32>
    %8 = arith.addf %5, %7 : vector<16x256xf32>
    %c0_9 = arith.constant 0 : index
    %c0_10 = arith.constant 0 : index
    %9 = vector.load %arg6[%c0_9, %c0_10] : memref<32x384xf32, #tpu.memory_space<vmem>>, vector<32x384xf32>
    %cst_11 = arith.constant dense<0.000000e+00> : vector<16x384xf32>
    %10 = tpu.matmul %0, %9, %cst_11 {dimension_numbers = #tpu.dot_dimension_numbers<[1], [0], [0], [1], [0, 0, 1, 1], [], []>} : vector<16x32xf32>, vector<32x384xf32>, vector<16x384xf32> -> vector<16x384xf32>
    %c0_12 = arith.constant 0 : index
    %c0_13 = arith.constant 0 : index
    %11 = vector.load %arg7[%c0_12, %c0_13] : memref<1x384xf32, #tpu.memory_space<vmem>>, vector<1x384xf32>
    %12 = vector.broadcast %11 : vector<1x384xf32> to vector<16x384xf32>
    %13 = arith.addf %10, %12 : vector<16x384xf32>
    %14 = vector.extract_strided_slice %8 {offsets = [0, 0], sizes = [16, 128], strides = [1, 1]} : vector<16x256xf32> to vector<16x128xf32>
    %15 = vector.extract_strided_slice %8 {offsets = [0, 128], sizes = [16, 128], strides = [1, 1]} : vector<16x256xf32> to vector<16x128xf32>
    %16 = vector.extract_strided_slice %13 {offsets = [0, 0], sizes = [16, 128], strides = [1, 1]} : vector<16x384xf32> to vector<16x128xf32>
    %17 = vector.extract_strided_slice %13 {offsets = [0, 128], sizes = [16, 128], strides = [1, 1]} : vector<16x384xf32> to vector<16x128xf32>
    %18 = vector.extract_strided_slice %13 {offsets = [0, 256], sizes = [16, 128], strides = [1, 1]} : vector<16x384xf32> to vector<16x128xf32>
    %cst_14 = arith.constant 0.353553385 : f32
    %19 = vector.broadcast %cst_14 : f32 to vector<16x128xf32>
    %20 = arith.mulf %14, %19 : vector<16x128xf32>
    %21 = vector.shape_cast %20 : vector<16x128xf32> to vector<2x8x4x32xf32>
    %22 = tpu.transpose %21, [0, 2, 1, 3] : vector<2x8x4x32xf32> -> vector<2x4x8x32xf32>
    %23 = vector.shape_cast %22 : vector<2x4x8x32xf32> to vector<8x8x32xf32>
    %24 = vector.shape_cast %15 : vector<16x128xf32> to vector<2x8x4x32xf32>
    %25 = tpu.transpose %24, [0, 2, 1, 3] : vector<2x8x4x32xf32> -> vector<2x4x8x32xf32>
    %26 = vector.shape_cast %25 : vector<2x4x8x32xf32> to vector<8x8x32xf32>
    %27 = vector.shape_cast %16 : vector<16x128xf32> to vector<2x8x4x32xf32>
    %28 = tpu.transpose %27, [0, 2, 1, 3] : vector<2x8x4x32xf32> -> vector<2x4x8x32xf32>
    %29 = vector.shape_cast %28 : vector<2x4x8x32xf32> to vector<8x8x32xf32>
    "tpu.trace_start"() <{level = 10 : i32, message = "bqd,bkd->bqk"}> : () -> ()
    %cst_15 = arith.constant dense<0.000000e+00> : vector<8x8x8xf32>
    %30 = tpu.matmul %23, %26, %cst_15 {dimension_numbers = #tpu.dot_dimension_numbers<[2], [2], [1], [1], [0, 0, 0, 1, 1, 1], [0], [0]>} : vector<8x8x32xf32>, vector<8x8x32xf32>, vector<8x8x8xf32> -> vector<8x8x8xf32>
    "tpu.trace_stop"() : () -> ()
    %31 = vector.shape_cast %3 : vector<8x8xf32> to vector<1x8x8xf32>
    %32 = vector.broadcast %31 : vector<1x8x8xf32> to vector<8x8x8xf32>
    %33 = arith.addf %30, %32 : vector<8x8x8xf32>
    %cst_16 = arith.constant dense<0xFF800000> : vector<8x8xf32>
    %34 = vector.multi_reduction <maximumf>, %33, %cst_16 [2] : vector<8x8x8xf32> to vector<8x8xf32>
    %35 = vector.shape_cast %34 : vector<8x8xf32> to vector<8x8x1xf32>
    %36 = vector.broadcast %35 : vector<8x8x1xf32> to vector<8x8x8xf32>
    %37 = arith.subf %33, %36 : vector<8x8x8xf32>
    %38 = math.exp %37 : vector<8x8x8xf32>
    %cst_17 = arith.constant dense<0.000000e+00> : vector<8x8xf32>
    %39 = vector.multi_reduction <add>, %38, %cst_17 [2] : vector<8x8x8xf32> to vector<8x8xf32>
    %40 = vector.shape_cast %39 : vector<8x8xf32> to vector<8x8x1xf32>
    %41 = tpu.reciprocal %40 {approx = true} : vector<8x8x1xf32> -> vector<8x8x1xf32>
    %42 = arith.mulf %40, %41 : vector<8x8x1xf32>
    %cst_18 = arith.constant 2.000000e+00 : f32
    %43 = vector.broadcast %cst_18 : f32 to vector<8x8x1xf32>
    %44 = arith.subf %43, %42 : vector<8x8x1xf32>
    %45 = arith.mulf %41, %44 : vector<8x8x1xf32>
    %46 = vector.broadcast %45 : vector<8x8x1xf32> to vector<8x8x8xf32>
    %47 = arith.mulf %38, %46 : vector<8x8x8xf32>
    "tpu.trace_start"() <{level = 10 : i32, message = "bqk,bkd->bqd"}> : () -> ()
    %cst_19 = arith.constant dense<0.000000e+00> : vector<8x8x32xf32>
    %48 = tpu.matmul %47, %29, %cst_19 {dimension_numbers = #tpu.dot_dimension_numbers<[2], [1], [1], [2], [0, 0, 0, 1, 1, 2], [0], [0]>} : vector<8x8x8xf32>, vector<8x8x32xf32>, vector<8x8x32xf32> -> vector<8x8x32xf32>
    "tpu.trace_stop"() : () -> ()
    %49 = vector.shape_cast %48 : vector<8x8x32xf32> to vector<2x4x8x32xf32>
    %50 = tpu.transpose %49, [0, 2, 1, 3] : vector<2x4x8x32xf32> -> vector<2x8x4x32xf32>
    %51 = vector.shape_cast %50 : vector<2x8x4x32xf32> to vector<16x128xf32>
    %c0_20 = arith.constant 0 : index
    %c0_21 = arith.constant 0 : index
    %52 = vector.load %arg8[%c0_20, %c0_21] : memref<128x128xf32, #tpu.memory_space<vmem>>, vector<128x128xf32>
    %cst_22 = arith.constant dense<0.000000e+00> : vector<16x128xf32>
    %53 = tpu.matmul %51, %52, %cst_22 {dimension_numbers = #tpu.dot_dimension_numbers<[1], [0], [0], [1], [0, 0, 1, 1], [], []>} : vector<16x128xf32>, vector<128x128xf32>, vector<16x128xf32> -> vector<16x128xf32>
    %c0_23 = arith.constant 0 : index
    %c0_24 = arith.constant 0 : index
    %54 = vector.load %arg9[%c0_23, %c0_24] : memref<1x128xf32, #tpu.memory_space<vmem>>, vector<1x128xf32>
    %55 = vector.broadcast %54 : vector<1x128xf32> to vector<16x128xf32>
    %56 = arith.addf %53, %55 : vector<16x128xf32>
    %cst_25 = arith.constant 0.353553385 : f32
    %57 = vector.broadcast %cst_25 : f32 to vector<16x128xf32>
    %58 = arith.mulf %56, %57 : vector<16x128xf32>
    %59 = vector.shape_cast %58 : vector<16x128xf32> to vector<2x8x4x32xf32>
    %60 = tpu.transpose %59, [0, 2, 1, 3] : vector<2x8x4x32xf32> -> vector<2x4x8x32xf32>
    %61 = vector.shape_cast %60 : vector<2x4x8x32xf32> to vector<8x8x32xf32>
    %62 = vector.shape_cast %17 : vector<16x128xf32> to vector<2x8x4x32xf32>
    %63 = tpu.transpose %62, [0, 2, 1, 3] : vector<2x8x4x32xf32> -> vector<2x4x8x32xf32>
    %64 = vector.shape_cast %63 : vector<2x4x8x32xf32> to vector<8x8x32xf32>
    %65 = vector.shape_cast %18 : vector<16x128xf32> to vector<2x8x4x32xf32>
    %66 = tpu.transpose %65, [0, 2, 1, 3] : vector<2x8x4x32xf32> -> vector<2x4x8x32xf32>
    %67 = vector.shape_cast %66 : vector<2x4x8x32xf32> to vector<8x8x32xf32>
    "tpu.trace_start"() <{level = 10 : i32, message = "bqd,bkd->bqk"}> : () -> ()
    %cst_26 = arith.constant dense<0.000000e+00> : vector<8x8x8xf32>
    %68 = tpu.matmul %61, %64, %cst_26 {dimension_numbers = #tpu.dot_dimension_numbers<[2], [2], [1], [1], [0, 0, 0, 1, 1, 1], [0], [0]>} : vector<8x8x32xf32>, vector<8x8x32xf32>, vector<8x8x8xf32> -> vector<8x8x8xf32>
    "tpu.trace_stop"() : () -> ()
    %69 = vector.shape_cast %3 : vector<8x8xf32> to vector<1x8x8xf32>
    %70 = vector.broadcast %69 : vector<1x8x8xf32> to vector<8x8x8xf32>
    %71 = arith.addf %68, %70 : vector<8x8x8xf32>
    %cst_27 = arith.constant dense<0xFF800000> : vector<8x8xf32>
    %72 = vector.multi_reduction <maximumf>, %71, %cst_27 [2] : vector<8x8x8xf32> to vector<8x8xf32>
    %73 = vector.shape_cast %72 : vector<8x8xf32> to vector<8x8x1xf32>
    %74 = vector.broadcast %73 : vector<8x8x1xf32> to vector<8x8x8xf32>
    %75 = arith.subf %71, %74 : vector<8x8x8xf32>
    %76 = math.exp %75 : vector<8x8x8xf32>
    %cst_28 = arith.constant dense<0.000000e+00> : vector<8x8xf32>
    %77 = vector.multi_reduction <add>, %76, %cst_28 [2] : vector<8x8x8xf32> to vector<8x8xf32>
    %78 = vector.shape_cast %77 : vector<8x8xf32> to vector<8x8x1xf32>
    %79 = tpu.reciprocal %78 {approx = true} : vector<8x8x1xf32> -> vector<8x8x1xf32>
    %80 = arith.mulf %78, %79 : vector<8x8x1xf32>
    %cst_29 = arith.constant 2.000000e+00 : f32
    %81 = vector.broadcast %cst_29 : f32 to vector<8x8x1xf32>
    %82 = arith.subf %81, %80 : vector<8x8x1xf32>
    %83 = arith.mulf %79, %82 : vector<8x8x1xf32>
    %84 = vector.broadcast %83 : vector<8x8x1xf32> to vector<8x8x8xf32>
    %85 = arith.mulf %76, %84 : vector<8x8x8xf32>
    "tpu.trace_start"() <{level = 10 : i32, message = "bqk,bkd->bqd"}> : () -> ()
    %cst_30 = arith.constant dense<0.000000e+00> : vector<8x8x32xf32>
    %86 = tpu.matmul %85, %67, %cst_30 {dimension_numbers = #tpu.dot_dimension_numbers<[2], [1], [1], [2], [0, 0, 0, 1, 1, 2], [0], [0]>} : vector<8x8x8xf32>, vector<8x8x32xf32>, vector<8x8x32xf32> -> vector<8x8x32xf32>
    "tpu.trace_stop"() : () -> ()
    %87 = vector.shape_cast %86 : vector<8x8x32xf32> to vector<2x4x8x32xf32>
    %88 = tpu.transpose %87, [0, 2, 1, 3] : vector<2x4x8x32xf32> -> vector<2x8x4x32xf32>
    %89 = vector.shape_cast %88 : vector<2x8x4x32xf32> to vector<16x128xf32>
    %c0_31 = arith.constant 0 : index
    %c0_32 = arith.constant 0 : index
    %90 = vector.load %arg10[%c0_31, %c0_32] : memref<128x128xf32, #tpu.memory_space<vmem>>, vector<128x128xf32>
    %cst_33 = arith.constant dense<0.000000e+00> : vector<16x128xf32>
    %91 = tpu.matmul %89, %90, %cst_33 {dimension_numbers = #tpu.dot_dimension_numbers<[1], [0], [0], [1], [0, 0, 1, 1], [], []>} : vector<16x128xf32>, vector<128x128xf32>, vector<16x128xf32> -> vector<16x128xf32>
    %c0_34 = arith.constant 0 : index
    %c0_35 = arith.constant 0 : index
    %92 = vector.load %arg11[%c0_34, %c0_35] : memref<1x128xf32, #tpu.memory_space<vmem>>, vector<1x128xf32>
    %93 = vector.broadcast %92 : vector<1x128xf32> to vector<16x128xf32>
    %94 = arith.addf %91, %93 : vector<16x128xf32>
    %c0_36 = arith.constant 0 : index
    %c0_37 = arith.constant 0 : index
    %95 = vector.load %arg12[%c0_36, %c0_37] : memref<16x128xf32, #tpu.memory_space<vmem>>, vector<16x128xf32>
    tpu.vector_store %arg12[%c0_36, %c0_37], %94 {strides = array<i32>} : memref<16x128xf32, #tpu.memory_space<vmem>>, vector<16x128xf32>,
    return
  }
  func.func @transform_0(%arg0: i32) -> (i32, i32) {
    %c0_i32 = arith.constant 0 : i32
    %c0_i32_0 = arith.constant 0 : i32
    return %arg0, %c0_i32 : i32, i32
  }
  func.func @transform_1(%arg0: i32) -> (i32, i32) {
    %c0_i32 = arith.constant 0 : i32
    %c0_i32_0 = arith.constant 0 : i32
    return %arg0, %c0_i32 : i32, i32
  }
  func.func @transform_2(%arg0: i32) -> (i32, i32) {
    %c0_i32 = arith.constant 0 : i32
    %c0_i32_0 = arith.constant 0 : i32
    %c0_i32_1 = arith.constant 0 : i32
    return %c0_i32, %c0_i32_0 : i32, i32
  }
  func.func @transform_3(%arg0: i32) -> (i32, i32) {
    %c0_i32 = arith.constant 0 : i32
    %c0_i32_0 = arith.constant 0 : i32
    %c0_i32_1 = arith.constant 0 : i32
    return %c0_i32, %c0_i32_0 : i32, i32
  }
  func.func @transform_4(%arg0: i32) -> (i32, i32) {
    %c0_i32 = arith.constant 0 : i32
    %c0_i32_0 = arith.constant 0 : i32
    %c0_i32_1 = arith.constant 0 : i32
    return %c0_i32, %c0_i32_0 : i32, i32
  }
  func.func @transform_5(%arg0: i32) -> (i32, i32) {
    %c0_i32 = arith.constant 0 : i32
    %c0_i32_0 = arith.constant 0 : i32
    %c0_i32_1 = arith.constant 0 : i32
    return %c0_i32, %c0_i32_0 : i32, i32
  }
  func.func @transform_6(%arg0: i32) -> (i32, i32) {
    %c0_i32 = arith.constant 0 : i32
    %c0_i32_0 = arith.constant 0 : i32
    %c0_i32_1 = arith.constant 0 : i32
    return %c0_i32, %c0_i32_0 : i32, i32
  }
  func.func @transform_7(%arg0: i32) -> (i32, i32) {
    %c0_i32 = arith.constant 0 : i32
    %c0_i32_0 = arith.constant 0 : i32
    %c0_i32_1 = arith.constant 0 : i32
    return %c0_i32, %c0_i32_0 : i32, i32
  }
  func.func @transform_8(%arg0: i32) -> (i32, i32) {
    %c0_i32 = arith.constant 0 : i32
    %c0_i32_0 = arith.constant 0 : i32
    %c0_i32_1 = arith.constant 0 : i32
    return %c0_i32, %c0_i32_0 : i32, i32
  }
  func.func @transform_9(%arg0: i32) -> (i32, i32) {
    %c0_i32 = arith.constant 0 : i32
    %c0_i32_0 = arith.constant 0 : i32
    %c0_i32_1 = arith.constant 0 : i32
    return %c0_i32, %c0_i32_0 : i32, i32
  }
  func.func @transform_10(%arg0: i32) -> (i32, i32) {
    %c0_i32 = arith.constant 0 : i32
    %c0_i32_0 = arith.constant 0 : i32
    %c0_i32_1 = arith.constant 0 : i32
    return %c0_i32, %c0_i32_0 : i32, i32
  }
  func.func @transform_11(%arg0: i32) -> (i32, i32) {
    %c0_i32 = arith.constant 0 : i32
    %c0_i32_0 = arith.constant 0 : i32
    return %arg0, %c0_i32 : i32, i32
  }
}

</mosaic_0001>

<bundles_post_ra>
// kernel: tpu_custom_call.1
= control target key start
LH: loop header
LB: loop body
LE: loop exit
PB: predicated region body
PF: predicated region fallthrough
CT: control target
= control target key end

     0   :  { %16 = vsyncpa [#allocation3], 0  ;;  %s4905_s0 = inlined_call_operand.hbm [shape: f32[16,32], index: 0, kind: input, shape index: {}]   ;;  %s4906_s1 = inlined_call_operand.hbm [shape: f32[16,32], index: 1, kind: input, shape index: {}]   ;;  %s4907_s2 = inlined_call_operand.hbm [shape: f32[8,8], index: 2, kind: input, shape index: {}]   ;;  %s4908_s3 = inlined_call_operand.hbm [shape: f32[32,256], index: 3, kind: input, shape index: {}]   ;;  %s4909_s4 = inlined_call_operand.vmem [shape: f32[1,256], index: 4, kind: input, shape index: {}]   ;;  %s4910_s5 = inlined_call_operand.hbm [shape: f32[32,384], index: 5, kind: input, shape index: {}]   ;;  %s4911_s6 = inlined_call_operand.vmem [shape: f32[1,384], index: 6, kind: input, shape index: {}]   ;;  %s4912_s7 = inlined_call_operand.hbm [shape: f32[128,128], index: 7, kind: input, shape index: {}]   ;;  %s4913_s8 = inlined_call_operand.vmem [shape: f32[1,128], index: 8, kind: input, shape index: {}]   ;;  %s4914_s9 = inlined_call_operand.hbm [shape: f32[128,128], index: 9, kind: input, shape index: {}]   ;;  %s4915_s10 = inlined_call_operand.vmem [shape: f32[1,128], index: 10, kind: input, shape index: {}]   ;;  %s4916_s11 = inlined_call_operand.hbm [shape: f32[16,128], index: 11, kind: output, shape index: {}]  }
   0x1   :  { %17 = vsyncpa [#allocation6], 0 }
   0x2   :  { %18 = vsyncpa [#allocation9], 0 }
   0x3   :  { %19 = vsyncpa [#allocation12], 0 }
   0x4   :  { %20 = vsyncpa [#allocation4], 0  ;;  %s38_s19 = sshll.u32 %s4906_s1, 4  ;;  %s3761_s20 = smov [#allocation5]   ;;  %s39_s19 = int_to_ptr.hbm [resolvable:$true] %s38_s19 }
   0x5   :  { %s40_s21 = sshll.u32 %s3761_s20, 4  ;;  %s62_s24 = sshll.u32 %s4908_s3, 4  ;;  %s41_s21 = int_to_ptr.vmem [resolvable:$true] %s40_s21  ;;  %s63_s24 = int_to_ptr.hbm [resolvable:$true] %s62_s24 }
   0x6   :  { %s3762_s25 = smov 128   ;;  %s3763_s26 = smov 8  }
   0x7   :  { %46 = dma.hbm_to_vmem [thread:$0]  %s39_s19, 256, %s41_s21, [#allocation6], %s3762_s25, %s3762_s25, %s3763_s26  }
   0x8   :  { %s3764_s27 = smov [#allocation8]   ;;  %s3765_s29 = smov 256  }
   0x9   :  { %s64_s28 = sshll.u32 %s3764_s27, 4  ;;  %s3766_s1 = smov 16   ;;  %s65_s28 = int_to_ptr.vmem [resolvable:$true] %s64_s28 }
   0xa   :  { %70 = dma.hbm_to_vmem [thread:$0]  %s63_s24, 1024, %s65_s28, [#allocation9], %s3765_s29, %s3765_s29, %s3766_s1  }
   0xb   :  { %s92_s13 = sshll.u32 %s4912_s7, 4  ;;  %s3767_s14 = smov [#allocation11]   ;;  %s93_s13 = int_to_ptr.hbm [resolvable:$true] %s92_s13 }
   0xc   :  { %s94_s3 = sshll.u32 %s3767_s14, 4  ;;  %s25_s17 = sshll.u32 %s4905_s0, 4  ;;  %s95_s3 = int_to_ptr.vmem [resolvable:$true] %s94_s3  ;;  %s26_s17 = int_to_ptr.hbm [resolvable:$true] %s25_s17 }
   0xd   :  { %100 = dma.hbm_to_vmem [thread:$0]  %s93_s13, 2048, %s95_s3, [#allocation12], %s3762_s25, %s3762_s25, %s3763_s26  }
   0xe   :  { %s3768_s18 = smov [#allocation2]   ;;  %s52_s22 = sshll.u32 %s4907_s2, 4  ;;  %s53_s22 = int_to_ptr.hbm [resolvable:$true] %s52_s22 }
   0xf   :  { %s27_s19 = sshll.u32 %s3768_s18, 4  ;;  %s77_s0 = sshll.u32 %s4910_s5, 4  ;;  %s28_s19 = int_to_ptr.vmem [resolvable:$true] %s27_s19  ;;  %s78_s0 = int_to_ptr.hbm [resolvable:$true] %s77_s0 }
  0x10   :  { %33 = dma.hbm_to_vmem [thread:$0]  %s26_s17, 256, %s28_s19, [#allocation3], %s3762_s25, %s3762_s25, %s3763_s26  }
  0x11   :  { %s3769_s24 = smov [#allocation7]   ;;  %s3770_s28 = smov [#allocation10]  }
  0x12   :  { %s54_s27 = sshll.u32 %s3769_s24, 4  ;;  %s79_s29 = sshll.u32 %s3770_s28, 4  ;;  %s55_s27 = int_to_ptr.vmem [resolvable:$true] %s54_s27  ;;  %s80_s29 = int_to_ptr.vmem [resolvable:$true] %s79_s29 }
  0x13   :  { %57 = dma.hbm_to_vmem [thread:$0]  %s53_s22, 128, %s55_s27, [#allocation6]  }
  0x14   :  { %s3771_s1 = smov 384   ;;  %s3772_s2 = smov 24  }
  0x15   :  { %85 = dma.hbm_to_vmem [thread:$0]  %s78_s0, 1536, %s80_s29, [#allocation9], %s3771_s1, %s3771_s1, %s3772_s2  }
  0x16   :  { %s107_s13 = sshll.u32 %s4914_s9, 4  ;;  %s3773_s14 = smov [#allocation13]   ;;  %s108_s13 = int_to_ptr.hbm [resolvable:$true] %s107_s13 }
  0x17   :  { %s109_s3 = sshll.u32 %s3773_s14, 4  ;;  %s110_s3 = int_to_ptr.vmem [resolvable:$true] %s109_s3 }
  0x18   :  { %115 = dma.hbm_to_vmem [thread:$0]  %s108_s13, 2048, %s110_s3, [#allocation12], %s3762_s25, %s3762_s25, %s3763_s26  }
  0x19   :  { %3751 = dma.done.wait [#allocation3], 256  }
  0x1a   :  { %3752 = vsyncadd [#allocation3], 4294967040 }
  0x1b   :  { %3753 = dma.done.wait [#allocation6], 384  }
  0x1c   :  { %3754 = vsyncadd [#allocation6], 4294966912 }
  0x1d   :  { %3755 = dma.done.wait [#allocation9], 2560  }
  0x1e   :  { %3756 = vsyncadd [#allocation9], 4294964736 }
  0x1f   :  { %3757 = dma.done.wait [#allocation12], 4096  }
  0x20   :  { %3758 = vsyncadd [#allocation12], 4294963200  ;;  %v159_v0 = vld [vmem:[#allocation8 + $0x30] sm:$0xff]  ;;  %v157_v1 = vld [vmem:[#allocation8 + $0x20] sm:$0xff]  ;;  %vm167_vm0 = vcmask 261120   ;;  %s3774_s15 = smov 32  }
  0x21   :  { %186 = vmatpush.msra.mxu0 %v159_v0  ;;  %3439 = vmatpush.msra.mxu1 %v159_v0  ;;  %v3873_v2 = vld [vmem:[#allocation2] sm:$0xff]  ;;  %v148_v3 = vld [vmem:[#allocation5] sm:$0xff]  ;;  %v155_v4 = vld [vmem:[#allocation8 + $0x10] sm:$0xff]  ;;  %s3775_s16 = smov 64   ;;  %v3777_v36 = vmov 1983009808  }
  0x22   :  { %v3875_v5 = vld [vmem:[#allocation2 + $0x8] sm:$0xff]  ;;  %v149_v6 = vld [vmem:[#allocation5 + $0x8] sm:$0xff]  ;;  %v150_v8 = vadd.f32 %v148_v3, %v3873_v2  ;;  %v160_v10 = vld [vmem:[#allocation8 + $0x38] sm:$0xff]  ;;  %v343_v37 = vunpack.c.l.s4 %v3777_v36  ;;  %vm338_vm1 = vcmask 1047556   ;;  %v3778_v46 = vmov 1934713408  }
  0x23   :  { %187 = vmatpush.msra.mxu0 %v157_v1  ;;  %3440 = vmatpush.msra.mxu1 %v157_v1  ;;  %v153_v7 = vld [vmem:[#allocation8] sm:$0xff]  ;;  %v151_v9 = vadd.f32 %v149_v6, %v3875_v5  ;;  %v158_v11 = vld [vmem:[#allocation8 + $0x28] sm:$0xff]  ;;  %v156_v12 = vld [vmem:[#allocation8 + $0x18] sm:$0xff]  ;;  %v367_v47 = vunpack.c.l.s4 %v3778_v46  ;;  %vm1246_vm2 = vcmask 64512   ;;  %vm1789_vm3 = vcmask 523264   ;;  %s3779_s21 = smov [#allocation14]  }
  0x24   :  { %v154_v13 = vld [vmem:[#allocation8 + $0x8] sm:$0xff]  ;;  %v161_v14 = vld [vmem:[%s4909_s4] sm:$0x3]  ;;  %s3776_s4 = smov 96   ;;  %v230_v27 = vld [vmem:[#allocation10 + $0x50] sm:$0xff]  ;;  %v3923_v43 = vunpack.c.0.s8 %v343_v37  ;;  %vm1792_vm4 = vcmask 785408  }
  0x25   :  { %188 = vmatpush.msra.mxu0 %v155_v4  ;;  %3441 = vmatpush.msra.mxu1 %v155_v4  ;;  %v163_v15 = vperm.slane %v161_v14, 0  ;;  %v164_v20 = vperm.slane %v161_v14, 1  ;;  %v227_v28 = vld [vmem:[#allocation10 + $0x38] sm:$0xff]  ;;  %v224_v30 = vld [vmem:[#allocation10 + $0x20] sm:$0xff]  ;;  %v221_v31 = vld [vmem:[#allocation10 + $0x8] sm:$0xff]  ;;  %v3933_v55 = vunpack.c.0.s8 %v367_v47  ;;  %s3363_s22 = sshll.u32 %s3779_s21, 4  ;;  %s3364_s22 = int_to_ptr.vmem [resolvable:$true] %s3363_s22 }
  0x26   :  { %v229_v33 = vld [vmem:[#allocation10 + $0x48] sm:$0xff]  ;;  %v226_v34 = vld [vmem:[#allocation10 + $0x30] sm:$0xff]  ;;  %v223_v38 = vld [vmem:[#allocation10 + $0x18] sm:$0xff]  ;;  %s3365_s0 = sshll.u32 %s4916_s11, 4  ;;  %s3366_s0 = int_to_ptr.hbm [resolvable:$true] %s3365_s0 }
  0x27   :  { %189 = vmatpush.msra.mxu0 %v153_v7  ;;  %3442 = vmatpush.msra.mxu1 %v153_v7  ;;  %v231_v40 = vld [vmem:[#allocation10 + $0x58] sm:$0xff]  ;;  %v228_v42 = vld [vmem:[#allocation10 + $0x40] sm:$0xff]  ;;  %v225_v48 = vld [vmem:[#allocation10 + $0x28] sm:$0xff] }
  0x28   :  { %3381 = vmatmul.msk.f32.vlgmr.msra.gmra.mxu0 %vm167_vm0, %v150_v8  ;;  %3382 = vmatmul.msk.f32.vlgmr.msra.gmra.mxu1 %vm167_vm0, %v151_v9  ;;  %v220_v44 = vld [vmem:[#allocation10] sm:$0xff]  ;;  %v222_v52 = vld [vmem:[#allocation10 + $0x10] sm:$0xff] }
  0x29   :  { %209 = vmatpush.msrb.mxu1 %v160_v10  ;;  %281 = vmatpush.msrb.mxu0 %v230_v27 }
  0x2a   :  { %258 = vmatpush.msra.mxu2 %v229_v33 }
  0x2b   :  { %210 = vmatpush.msrb.mxu1 %v158_v11  ;;  %282 = vmatpush.msrb.mxu0 %v227_v28 }
  0x2c   :  { %259 = vmatpush.msra.mxu2 %v226_v34 }
  0x2d   :  { %211 = vmatpush.msrb.mxu1 %v156_v12  ;;  %283 = vmatpush.msrb.mxu0 %v224_v30 }
  0x2e   :  { %260 = vmatpush.msra.mxu2 %v223_v38 }
  0x2f   :  { %212 = vmatpush.msrb.mxu1 %v154_v13  ;;  %284 = vmatpush.msrb.mxu0 %v221_v31 }
  0x30   :  { %3383 = vmatmul.msk.f32.vlgmr.msrb.gmra.mxu1 %vm167_vm0, %v150_v8  ;;  %3387 = vmatmul.msk.f32.vlgmr.msrb.gmra.mxu0 %vm167_vm0, %v3873_v2 }
  0x31   :  { %304 = vmatpush.msra.mxu0 %v231_v40  ;;  %261 = vmatpush.msra.mxu2 %v220_v44 }
  0x32   :  { %3385 = vmatmul.msk.f32.vlgmr.msra.gmra.mxu2 %vm167_vm0, %v3873_v2 }
  0x33   :  { %305 = vmatpush.msra.mxu0 %v228_v42 }
  0x35   :  { %306 = vmatpush.msra.mxu0 %v225_v48 }
  0x37   :  { %307 = vmatpush.msra.mxu0 %v222_v52 }
  0x38   :  { %3384 = vmatmul.msk.f32.gmra.mxu1 %vm167_vm0, %v151_v9  ;;  %3388 = vmatmul.msk.f32.gmra.mxu0 %vm167_vm0, %v3875_v5 }
  0x3a   :  { %3386 = vmatmul.msk.f32.gmra.mxu2 %vm167_vm0, %v3875_v5 }
  0x40   :  { %3389 = vmatmul.msk.f32.vlgmr.msra.gmra.mxu0 %vm167_vm0, %v3873_v2 }
  0x48   :  { %3390 = vmatmul.msk.f32.gmra.mxu0 %vm167_vm0, %v3875_v5 }
  0xa5   :  { %v191_v16 = vpop.f32.mrf.mxu0  ;;  %v194_v17 = vpop.f32.mrf.mxu1 }
  0xa6   :  { %v192_v18 = vadd.f32 %v191_v16, %v163_v15  ;;  %v195_v25 = vadd.f32 %v194_v17, %v163_v15 }
  0xa8   :  { %v3886_v19 = vmul.f32 0.35355338, %v192_v18  ;;  %v3908_v26 = vmul.f32 0.35355338, %v195_v25 }
  0xaa   :  { %331 = vrot.lane.b32.xlu2 %v3886_v19, %s3774_s15  ;;  %325 = vrot.lane.b32.xlu1 %v3886_v19, %s3775_s16  ;;  %v340_v51 = vrot.slane %v3886_v19, 4 }
  0xad   :  { %v214_v21 = vpop.f32.mrf.mxu1 }
  0xae   :  { %v3892_v22 = vadd.f32 %v214_v21, %v164_v20 }
  0xb0   :  { %566 = vrot.lane.b32.xlu0 %v3892_v22, %s3775_s16  ;;  %v580_v7 = vrot.slane %v3892_v22, 4 }
  0xb2   :  { %319 = vrot.lane.b32.xlu2 %v3886_v19, %s3776_s4  ;;  %560 = vrot.lane.b32.xlu1 %v3892_v22, %s3776_s4 }
  0xb5   :  { %v217_v23 = vpop.f32.mrf.mxu1 }
  0xb6   :  { %v3900_v24 = vadd.f32 %v217_v23, %v164_v20 }
  0xb8   :  { %572 = vrot.lane.b32.xlu0 %v3892_v22, %s3774_s15  ;;  %v636_v25 = vrot.slane %v3900_v24, 4 }
  0xba   :  { %574 = vrot.lane.b32.xlu2 %v3900_v24, %s3774_s15  ;;  %568 = vrot.lane.b32.xlu1 %v3900_v24, %s3775_s16 }
  0xc0   :  { %562 = vrot.lane.b32.xlu0 %v3900_v24, %s3776_s4 }
  0xc2   :  { %333 = vrot.lane.b32.xlu2 %v3908_v26, %s3774_s15  ;;  %327 = vrot.lane.b32.xlu1 %v3908_v26, %s3775_s16 }
  0xc8   :  { %321 = vrot.lane.b32.xlu0 %v3908_v26, %s3776_s4 }
 0x104   :  { %v332_v29 = vpop.permute.xlu2 %331 }
 0x105   :  { %v350_v39 = vrot.slane %v332_v29, 4 }
 0x10c   :  { %v320_v32 = vpop.permute.xlu2 %319 }
 0x10d   :  { %v352_v35 = vrot.slane %v320_v32, 4  ;;  %v351_v45 = vsel %vm338_vm1, %v350_v39, %v320_v32 }
 0x10e   :  { %v357_v53 = vperm.slane %v351_v45, %v3923_v43 }
 0x10f   :  { %v353_v41 = vsel %vm338_vm1, %v332_v29, %v352_v35 }
 0x110   :  { %v361_v49 = vperm.slane %v353_v41, %v3923_v43  ;;  %v362_v61 = vrot.slane %v357_v53, 4 }
 0x112   :  { %v374_v58 = vrot.slane %v361_v49, 4 }
 0x114   :  { %v3927_v50 = vpop.permute.xlu2 %574 }
 0x115   :  { %v646_v20 = vrot.slane %v3927_v50, 4 }
 0x11c   :  { %v326_v54 = vpop.permute.xlu1 %325  ;;  %v3951_v11 = vpop.permute.xlu2 %333 }
 0x11d   :  { %v337_v56 = vrot.slane %v326_v54, 4  ;;  %v341_v57 = vsel %vm338_vm1, %v326_v54, %v340_v51  ;;  %v406_v27 = vrot.slane %v3951_v11, 4 }
 0x11e   :  { %v349_v59 = vperm.slane %v341_v57, %v3923_v43 }
 0x11f   :  { %v339_v60 = vsel %vm338_vm1, %v337_v56, %v3886_v19  ;;  %v396_v19 = vrot.slane %v3908_v26, 4 }
 0x120   :  { %v345_v62 = vperm.slane %v339_v60, %v3923_v43  ;;  %v375_v63 = vsel %vm338_vm1, %v374_v58, %v349_v59  ;;  %v376_v0 = vrot.slane %v349_v59, 4 }
 0x121   :  { %v381_v1 = vperm.slane %v375_v63, %v3933_v55 }
 0x122   :  { %v363_v3 = vsel %vm338_vm1, %v362_v61, %v345_v62  ;;  %v364_v4 = vrot.slane %v345_v62, 4  ;;  %v377_v6 = vsel %vm338_vm1, %v361_v49, %v376_v0  ;;  %v567_v2 = vpop.permute.xlu0 %566 }
 0x123   :  { %v369_v8 = vperm.slane %v363_v3, %v3933_v55  ;;  %v385_v9 = vperm.slane %v377_v6, %v3933_v55  ;;  %v578_v10 = vrot.slane %v567_v2, 4  ;;  %v390_v13 = vrot.slane %v381_v1, 4 }
 0x124   :  { %v365_v12 = vsel %vm338_vm1, %v357_v53, %v364_v4  ;;  %v581_v14 = vsel %vm338_vm1, %v567_v2, %v580_v7  ;;  %v561_v15 = vpop.permute.xlu1 %560 }
 0x125   :  { %v373_v16 = vperm.slane %v365_v12, %v3933_v55  ;;  %v386_v17 = vrot.slane %v369_v8, 4  ;;  %v392_v18 = vrot.slane %v385_v9, 4  ;;  %v579_v21 = vsel %vm338_vm1, %v578_v10, %v3892_v22 }
 0x126   :  { %v589_v23 = vperm.slane %v581_v14, %v3923_v43  ;;  %v391_v31 = vsel %vm338_vm1, 0.0, %v390_v13  ;;  %v585_v33 = vperm.slane %v579_v21, %v3923_v43  ;;  %v592_v35 = vrot.slane %v561_v15, 4 }
 0x127   :  { %v388_v28 = vrot.slane %v373_v16, 4  ;;  %v393_v29 = vsel %vm338_vm1, 0.0, %v392_v18  ;;  %v461_v30 = vsel %vm338_vm1, %v392_v18, %v381_v1  ;;  %v387_v22 = vsel %vm338_vm1, 0.0, %v386_v17 }
 0x128   :  { %v3969_v5 = vperm.slane %v461_v30, %v3923_v43  ;;  %v466_v32 = vrot.slane %v393_v29, 4  ;;  %v616_v39 = vrot.slane %v589_v23, 4  ;;  %v604_v44 = vrot.slane %v585_v33, 4 }
 0x129   :  { %v389_v34 = vsel %vm338_vm1, 0.0, %v388_v28  ;;  %v450_v36 = vsel %vm338_vm1, %v388_v28, %v369_v8 }
 0x12a   :  { %v455_v37 = vrot.slane %v389_v34, 4  ;;  %v467_v38 = vsel %vm338_vm1, %v466_v32, %v391_v31  ;;  %v573_v40 = vpop.permute.xlu0 %572  ;;  %v3977_v41 = vperm.slane %v450_v36, %v3923_v43  ;;  %v486_v52 = vrot.slane %v3969_v5, 4 }
 0x12b   :  { %v3980_v42 = vperm.slane %v467_v38, %v3923_v43  ;;  %v590_v45 = vrot.slane %v573_v40, 4  ;;  %v593_v46 = vsel %vm338_vm1, %v573_v40, %v592_v35 }
 0x12c   :  { %v601_v47 = vperm.slane %v593_v46, %v3923_v43  ;;  %v569_v48 = vpop.permute.xlu1 %568  ;;  %v456_v49 = vsel %vm338_vm1, %v455_v37, %v387_v22  ;;  %v474_v51 = vrot.slane %v3977_v41, 4 }
 0x12d   :  { %v484_v53 = vrot.slane %v3980_v42, 4  ;;  %v591_v54 = vsel %vm338_vm1, %v590_v45, %v561_v15  ;;  %v634_v56 = vrot.slane %v569_v48, 4  ;;  %v637_v57 = vsel %vm338_vm1, %v569_v48, %v636_v25 }
 0x12e   :  { %v597_v58 = vperm.slane %v591_v54, %v3923_v43  ;;  %v614_v59 = vrot.slane %v601_v47, 4  ;;  %v617_v60 = vsel %vm338_vm1, %v601_v47, %v616_v39  ;;  %v645_v61 = vperm.slane %v637_v57, %v3923_v43 }
 0x12f   :  { %v625_v62 = vperm.slane %v617_v60, %v3933_v55  ;;  %v635_v63 = vsel %vm338_vm1, %v634_v56, %v3900_v24  ;;  %v3997_v0 = vperm.slane %v456_v49, %v3923_v43  ;;  %v485_v1 = vsel %vm338_vm1, %v484_v53, %v3969_v5 }
 0x130   :  { %v602_v3 = vrot.slane %v597_v58, 4  ;;  %v605_v4 = vsel %vm338_vm1, %v597_v58, %v604_v44  ;;  %v615_v6 = vsel %vm338_vm1, %v614_v59, %v589_v23  ;;  %v641_v2 = vperm.slane %v635_v63, %v3923_v43 }
 0x131   :  { %v613_v7 = vperm.slane %v605_v4, %v3933_v55  ;;  %v621_v8 = vperm.slane %v615_v6, %v3933_v55  ;;  %v632_v9 = vrot.slane %v625_v62, 4  ;;  %v672_v10 = vrot.slane %v645_v61, 4 }
 0x132   :  { %v603_v24 = vsel %vm338_vm1, %v602_v3, %v585_v33  ;;  %v660_v12 = vrot.slane %v641_v2, 4  ;;  %v563_v13 = vpop.permute.xlu0 %562  ;;  %v472_v14 = vrot.slane %v3997_v0, 4  ;;  %v4009_v15 = vperm.slane %v485_v1, %v3933_v55 }
 0x133   :  { %v609_v16 = vperm.slane %v603_v24, %v3933_v55  ;;  %v628_v17 = vrot.slane %v613_v7, 4  ;;  %v630_v18 = vrot.slane %v621_v8, 4  ;;  %v633_v21 = vsel %vm338_vm1, 0.0, %v632_v9 }
 0x134   :  { %v701_v23 = vsel %vm338_vm1, %v632_v9, %v621_v8  ;;  %v706_v25 = vrot.slane %v633_v21, 4  ;;  %v647_v28 = vsel %vm338_vm1, %v646_v20, %v563_v13  ;;  %v648_v29 = vrot.slane %v563_v13, 4  ;;  %v328_v30 = vpop.permute.xlu1 %327 }
 0x135   :  { %v626_v31 = vrot.slane %v609_v16, 4  ;;  %v629_v32 = vsel %vm338_vm1, 0.0, %v628_v17  ;;  %v631_v33 = vsel %vm338_vm1, 0.0, %v630_v18  ;;  %v4018_v22 = vperm.slane %v701_v23, %v3923_v43 }
 0x136   :  { %v695_v34 = vrot.slane %v629_v32, 4  ;;  %v707_v35 = vsel %vm338_vm1, %v706_v25, %v631_v33  ;;  %v649_v36 = vsel %vm338_vm1, %v3927_v50, %v648_v29  ;;  %v653_v37 = vperm.slane %v647_v28, %v3923_v43 }
 0x137   :  { %v627_v20 = vsel %vm338_vm1, 0.0, %v626_v31  ;;  %v4026_v38 = vperm.slane %v707_v35, %v3923_v43  ;;  %v657_v39 = vperm.slane %v649_v36, %v3923_v43  ;;  %v394_v40 = vrot.slane %v328_v30, 4 }
 0x138   :  { %v658_v44 = vrot.slane %v653_v37, 4  ;;  %v661_v45 = vsel %vm338_vm1, %v653_v37, %v660_v12  ;;  %v397_v46 = vsel %vm338_vm1, %v328_v30, %v396_v19  ;;  %v690_v47 = vsel %vm338_vm1, %v628_v17, %v609_v16 }
 0x139   :  { %v669_v50 = vperm.slane %v661_v45, %v3933_v55  ;;  %v670_v48 = vrot.slane %v657_v39, 4  ;;  %v673_v49 = vsel %vm338_vm1, %v657_v39, %v672_v10  ;;  %v395_v53 = vsel %vm338_vm1, %v394_v40, %v3908_v26 }
 0x13a   :  { %v659_v54 = vsel %vm338_vm1, %v658_v44, %v641_v2  ;;  %v681_v56 = vperm.slane %v673_v49, %v3933_v55  ;;  %v401_v57 = vperm.slane %v395_v53, %v3923_v43  ;;  %v405_v58 = vperm.slane %v397_v46, %v3923_v43  ;;  %v322_v59 = vpop.permute.xlu0 %321 }
 0x13b   :  { %v665_v19 = vperm.slane %v659_v54, %v3933_v55  ;;  %v671_v60 = vsel %vm338_vm1, %v670_v48, %v645_v61  ;;  %v684_v62 = vrot.slane %v669_v50, 4  ;;  %v407_v63 = vsel %vm338_vm1, %v406_v27, %v322_v59 }
 0x13c   :  { %v677_v26 = vperm.slane %v671_v60, %v3933_v55  ;;  %v688_v1 = vrot.slane %v681_v56, 4  ;;  %v420_v3 = vrot.slane %v401_v57, 4  ;;  %v432_v4 = vrot.slane %v405_v58, 4 }
 0x13d   :  { %v682_v6 = vrot.slane %v665_v19, 4  ;;  %v685_v2 = vsel %vm338_vm1, 0.0, %v684_v62  ;;  %v744_v7 = vsel %vm338_vm1, %v684_v62, %v665_v19  ;;  %v408_v8 = vrot.slane %v322_v59, 4 }
 0x13e   :  { %v686_v9 = vrot.slane %v677_v26, 4  ;;  %v689_v10 = vsel %vm338_vm1, 0.0, %v688_v1  ;;  %v4052_v61 = vperm.slane %v744_v7, %v3923_v43  ;;  %v749_v24 = vrot.slane %v685_v2, 4 }
 0x13f   :  { %v683_v27 = vsel %vm338_vm1, 0.0, %v682_v6  ;;  %v755_v12 = vsel %vm338_vm1, %v688_v1, %v677_v26  ;;  %v760_v13 = vrot.slane %v689_v10, 4  ;;  %v409_v16 = vsel %vm338_vm1, %v3951_v11, %v408_v8 }
 0x140   :  { %v687_v17 = vsel %vm338_vm1, 0.0, %v686_v9  ;;  %v750_v18 = vsel %vm338_vm1, %v749_v24, %v683_v27  ;;  %v768_v21 = vrot.slane %v4052_v61, 4  ;;  %v413_v23 = vperm.slane %v407_v63, %v3923_v43 }
 0x141   :  { %v4063_v25 = vperm.slane %v750_v18, %v3923_v43  ;;  %v417_v28 = vperm.slane %v409_v16, %v3923_v43  ;;  %v694_v29 = vperm.slane %v690_v47, %v3923_v43  ;;  %v696_v30 = vsel %vm338_vm1, %v695_v34, %v627_v20 }
 0x142   :  { %v418_v31 = vrot.slane %v413_v23, 4  ;;  %v421_v11 = vsel %vm338_vm1, %v413_v23, %v420_v3  ;;  %v700_v32 = vperm.slane %v696_v30, %v3923_v43  ;;  %v724_v33 = vrot.slane %v4026_v38, 4 }
 0x143   :  { %v429_v35 = vperm.slane %v421_v11, %v3933_v55  ;;  %v430_v36 = vrot.slane %v417_v28, 4  ;;  %v433_v37 = vsel %vm338_vm1, %v417_v28, %v432_v4  ;;  %v714_v39 = vrot.slane %v694_v29, 4 }
 0x144   :  { %v419_v40 = vsel %vm338_vm1, %v418_v31, %v401_v57  ;;  %v441_v44 = vperm.slane %v433_v37, %v3933_v55  ;;  %v712_v45 = vrot.slane %v700_v32, 4  ;;  %v725_v34 = vsel %vm338_vm1, %v724_v33, %v4018_v22 }
 0x145   :  { %v425_v20 = vperm.slane %v419_v40, %v3933_v55  ;;  %v431_v46 = vsel %vm338_vm1, %v430_v36, %v405_v58  ;;  %v444_v47 = vrot.slane %v429_v35, 4  ;;  %v731_v50 = vperm.slane %v725_v34, %v3933_v55 }
 0x146   :  { %v4081_v48 = vperm.slane %v431_v46, %v3933_v55  ;;  %v4083_v49 = vrot.slane %v441_v44, 4  ;;  %v713_v53 = vsel %vm338_vm1, %v712_v45, %v694_v29  ;;  %v715_v54 = vsel %vm338_vm1, %v700_v32, %v714_v39 }
 0x147   :  { %v442_v56 = vrot.slane %v425_v20, 4  ;;  %v445_v57 = vsel %vm338_vm1, 0.0, %v444_v47  ;;  %v504_v59 = vsel %vm338_vm1, %v444_v47, %v425_v20  ;;  %v719_v19 = vperm.slane %v713_v53, %v3933_v55 }
 0x148   :  { %v446_v58 = vrot.slane %v4081_v48, 4  ;;  %v4093_v60 = vsel %vm338_vm1, 0.0, %v4083_v49  ;;  %v509_v62 = vrot.slane %v445_v57, 4  ;;  %v736_v63 = vrot.slane %v731_v50, 4 }
 0x149   :  { %v443_v26 = vsel %vm338_vm1, 0.0, %v442_v56  ;;  %v520_v1 = vrot.slane %v4093_v60, 4  ;;  %v723_v3 = vperm.slane %v715_v54, %v3933_v55  ;;  %v726_v4 = vrot.slane %v4018_v22, 4 }
 0x14a   :  { %v510_v6 = vsel %vm338_vm1, %v509_v62, %v443_v26  ;;  %v737_v2 = vsel %vm338_vm1, %v736_v63, %v719_v19  ;;  %v738_v7 = vrot.slane %v719_v19, 4  ;;  %v473_v8 = vsel %vm338_vm1, %v472_v14, %v3977_v41 }
 0x14b   :  { %3391 = vmatpush.xpose.msk.msra.mxu1 %vm167_vm0, %v737_v2  ;;  %v727_v9 = vsel %vm338_vm1, %v4026_v38, %v726_v4  ;;  %v742_v10 = vrot.slane %v723_v3, 4  ;;  %v479_v24 = vperm.slane %v473_v8, %v3933_v55  ;;  %v496_v22 = vrot.slane %v4009_v15, 4 }
 0x14c   :  { %v735_v27 = vperm.slane %v727_v9, %v3933_v55  ;;  %v739_v16 = vsel %vm338_vm1, %v731_v50, %v738_v7  ;;  %v759_v18 = vperm.slane %v755_v12, %v3923_v43  ;;  %v761_v23 = vsel %vm338_vm1, %v760_v13, %v687_v17 }
 0x14d   :  { %3393 = vmatpush.xpose.msk.msrb.mxu2 %vm167_vm0, %v739_v16  ;;  %v497_v14 = vsel %vm338_vm1, %v496_v22, %v479_v24  ;;  %v498_v28 = vrot.slane %v479_v24, 4  ;;  %v765_v38 = vperm.slane %v761_v23, %v3923_v43  ;;  %v769_v29 = vsel %vm338_vm1, %v4063_v25, %v768_v21  ;;  %v232_v23 = vld [vmem:[%s4911_s6] sm:$0x7] }
 0x14e   :  { %v743_v30 = vsel %vm338_vm1, %v735_v27, %v742_v10  ;;  %3392 = vmatmul.msk.f32.vlgmr.msra.gmra.mxu1 %vm167_vm0, %v497_v14  ;;  %v740_v31 = vrot.slane %v735_v27, 4  ;;  %v777_v11 = vperm.slane %v769_v29, %v3933_v55  ;;  %v780_v12 = vrot.slane %v759_v18, 4 }
 0x14f   :  { %3397 = vmatpush.xpose.msk.msrb.mxu1 %vm167_vm0, %v743_v30  ;;  %v499_v13 = vsel %vm338_vm1, %v4009_v15, %v498_v28  ;;  %v766_v17 = vrot.slane %v4063_v25, 4  ;;  %v778_v32 = vrot.slane %v765_v38, 4  ;;  %v475_v21 = vsel %vm338_vm1, %v3997_v0, %v474_v51  ;;  %v286_v28 = vpop.f32.mrf.mxu0 }
 0x150   :  { %v741_v33 = vsel %vm338_vm1, %v740_v31, %v723_v3  ;;  %3394 = vmatmul.msk.f32.vlgmr.msrb.gmra.mxu2 %vm167_vm0, %v499_v13  ;;  %v781_v35 = vsel %vm338_vm1, %v765_v38, %v780_v12  ;;  %v796_v36 = vrot.slane %v777_v11, 4  ;;  %v483_v37 = vperm.slane %v475_v21, %v3933_v55 }
 0x151   :  { %3395 = vmatpush.xpose.msk.msra.mxu2 %vm167_vm0, %v741_v33  ;;  %v789_v15 = vperm.slane %v781_v35, %v3933_v55  ;;  %v767_v25 = vsel %vm338_vm1, %v766_v17, %v4052_v61  ;;  %v779_v41 = vsel %vm338_vm1, %v778_v32, %v759_v18  ;;  %v487_v51 = vsel %vm338_vm1, %v3980_v42, %v486_v52  ;;  %v263_v32 = vpop.f32.mrf.mxu2  ;;  %v152_v33 = vld [vmem:[#allocation7] sm:$0xff] }
 0x152   :  { %v773_v0 = vperm.slane %v767_v25, %v3933_v55  ;;  %v785_v39 = vperm.slane %v779_v41, %v3933_v55  ;;  %v495_v40 = vperm.slane %v487_v51, %v3933_v55  ;;  %v502_v44 = vrot.slane %v483_v37, 4 }
 0x153   :  { %v797_v45 = vsel %vm338_vm1, %v789_v15, %v796_v36  ;;  %v794_v34 = vrot.slane %v789_v15, 4  ;;  %v447_v20 = vsel %vm338_vm1, 0.0, %v446_v58  ;;  %v508_v61 = vperm.slane %v504_v59, %v3923_v43 }
 0x154   :  { %3405 = vmatpush.xpose.msk.msra.mxu1 %vm167_vm0, %v797_v45  ;;  %v790_v5 = vrot.slane %v785_v39, 4  ;;  %v792_v46 = vrot.slane %v773_v0, 4  ;;  %v503_v42 = vsel %vm338_vm1, %v495_v40, %v502_v44  ;;  %v500_v52 = vrot.slane %v495_v40, 4 }
 0x155   :  { %v795_v47 = vsel %vm338_vm1, %v794_v34, %v777_v11  ;;  %v514_v50 = vperm.slane %v510_v6, %v3923_v43  ;;  %v515_v53 = vsel %vm338_vm1, %v4083_v49, %v4081_v48  ;;  %v521_v54 = vsel %vm338_vm1, %v520_v1, %v447_v20 }
 0x156   :  { %v793_v56 = vsel %vm338_vm1, %v785_v39, %v792_v46  ;;  %3403 = vmatpush.xpose.msk.msrb.mxu0 %vm167_vm0, %v795_v47  ;;  %v791_v57 = vsel %vm338_vm1, %v790_v5, %v773_v0  ;;  %3398 = vmatmul.msk.f32.vlgmr.msrb.gmra.mxu1 %vm167_vm0, %v503_v42  ;;  %v528_v59 = vrot.slane %v508_v61, 4  ;;  %v501_v19 = vsel %vm338_vm1, %v500_v52, %v483_v37 }
 0x157   :  { %3401 = vmatpush.xpose.msk.msra.mxu3 %vm167_vm0, %v793_v56  ;;  %3399 = vmatpush.xpose.msk.msrb.mxu2 %vm167_vm0, %v791_v57  ;;  %v519_v58 = vperm.slane %v515_v53, %v3923_v43  ;;  %v525_v48 = vperm.slane %v521_v54, %v3923_v43  ;;  %v526_v49 = vrot.slane %v514_v50, 4  ;;  %v235_v14 = vperm.slane %v232_v23, 1  ;;  %v289_v29 = vpop.f32.mrf.mxu0 }
 0x158   :  { %3396 = vmatmul.msk.f32.vlgmr.msra.gmra.mxu2 %vm167_vm0, %v501_v19  ;;  %v529_v60 = vsel %vm338_vm1, %v514_v50, %v528_v59  ;;  %v236_v31 = vperm.slane %v232_v23, 2  ;;  %v234_v57 = vperm.slane %v232_v23, 0 }
 0x159   :  { %v527_v62 = vsel %vm338_vm1, %v526_v49, %v508_v61  ;;  %v538_v63 = vrot.slane %v525_v48, 4  ;;  %v540_v26 = vrot.slane %v519_v58, 4  ;;  %v537_v1 = vperm.slane %v529_v60, %v3933_v55  ;;  %v266_v21 = vpop.f32.mrf.mxu2 }
 0x15a   :  { %v533_v3 = vperm.slane %v527_v62, %v3933_v55  ;;  %v4186_v38 = vadd.f32 %v286_v28, %v235_v14  ;;  %v4188_v30 = vadd.f32 %v289_v29, %v235_v14  ;;  %v4202_v59 = vadd.f32 %v263_v32, %v234_v57 }
 0x15b   :  { %v539_v4 = vsel %vm338_vm1, %v538_v63, %v519_v58  ;;  %v541_v6 = vsel %vm338_vm1, %v525_v48, %v540_v26  ;;  %v556_v2 = vrot.slane %v537_v1, 4  ;;  %v4204_v19 = vadd.f32 %v266_v21, %v234_v57 }
 0x15c   :  { %v545_v7 = vperm.slane %v539_v4, %v3933_v55  ;;  %v552_v8 = vrot.slane %v533_v3, 4  ;;  %v549_v9 = vperm.slane %v541_v6, %v3933_v55 }
 0x15d   :  { %v3472_v58 = vpack.i.bf16 %v4204_v19, %v4202_v59 }
 0x15e   :  { %v550_v10 = vrot.slane %v545_v7, 4  ;;  %v553_v24 = vsel %vm338_vm1, %v545_v7, %v552_v8  ;;  %v554_v22 = vrot.slane %v549_v9, 4  ;;  %v557_v27 = vsel %vm338_vm1, %v549_v9, %v556_v2 }
 0x15f   :  { %3402 = vmatmul.msk.f32.vlgmr.msra.gmra.mxu3 %vm167_vm0, %v553_v24  ;;  %3406 = vmatmul.msk.f32.vlgmr.msra.gmra.mxu1 %vm167_vm0, %v557_v27  ;;  %v309_v11 = vpop.f32.mrf.mxu0 }
 0x160   :  { %v555_v16 = vsel %vm338_vm1, %v554_v22, %v537_v1  ;;  %v551_v18 = vsel %vm338_vm1, %v550_v10, %v533_v3  ;;  %v4190_v12 = vadd.f32 %v309_v11, %v236_v31 }
 0x161   :  { %3404 = vmatmul.msk.f32.vlgmr.msrb.gmra.mxu0 %vm167_vm0, %v555_v16  ;;  %3400 = vmatmul.msk.f32.vlgmr.msrb.gmra.mxu2 %vm167_vm0, %v551_v18 }
 0x167   :  { %v312_v13 = vpop.f32.mrf.mxu0 }
 0x168   :  { %v4192_v17 = vadd.f32 %v312_v13, %v236_v31 }
 0x1cb   :  { %v1061_v35 = vpop.f32.mrf.mxu1 }
 0x1cc   :  { %v1062_v36 = vadd.f32 %v1061_v35, %v152_v33 }
 0x1ce   :  { %v1247_v37 = vsel %vm1246_vm2, %v1062_v36, -inf }
 0x1cf   :  { %1248 = vmax.xlane.f32.xlu0 %v1247_v37 }
 0x1d3   :  { %v1087_v15 = vpop.f32.mrf.mxu2  ;;  %v1139_v25 = vpop.f32.mrf.mxu1 }
 0x1d4   :  { %v1088_v41 = vadd.f32 %v1087_v15, %v152_v33  ;;  %v1140_v42 = vadd.f32 %v1139_v25, %v152_v33 }
 0x1d6   :  { %v1250_v51 = vsel %vm1246_vm2, %v1088_v41, -inf  ;;  %v1256_v53 = vsel %vm1246_vm2, %v1140_v42, -inf }
 0x1d7   :  { %1251 = vmax.xlane.f32.xlu1 %v1250_v51  ;;  %v876_v51 = vrot.slane %v4204_v19, 4 }
 0x1db   :  { %v1113_v0 = vpop.f32.mrf.mxu2 }
 0x1dc   :  { %v1243_v39 = vpop.f32.mrf.mxu1  ;;  %v1114_v54 = vadd.f32 %v1113_v0, %v152_v33 }
 0x1dd   :  { %v1244_v40 = vadd.f32 %v1243_v39, %v152_v33 }
 0x1de   :  { %v1217_v44 = vpop.f32.mrf.mxu0  ;;  %v1253_v56 = vsel %vm1246_vm2, %v1114_v54, -inf }
 0x1df   :  { %v1218_v45 = vadd.f32 %v1217_v44, %v152_v33  ;;  %v1268_v34 = vsel %vm1246_vm2, %v1244_v40, -inf }
 0x1e0   :  { %1269 = vmax.xlane.f32.xlu0 %v1268_v34 }
 0x1e1   :  { %v1265_v20 = vsel %vm1246_vm2, %v1218_v45, -inf }
 0x1e2   :  { %1266 = vmax.xlane.f32.xlu2 %v1265_v20  ;;  %v1191_v61 = vpop.f32.mrf.mxu3 }
 0x1e3   :  { %v1192_v5 = vadd.f32 %v1191_v61, %v152_v33 }
 0x1e4   :  { %v1165_v46 = vpop.f32.mrf.mxu2 }
 0x1e5   :  { %v1262_v52 = vsel %vm1246_vm2, %v1192_v5, -inf  ;;  %v1166_v47 = vadd.f32 %v1165_v46, %v152_v33 }
 0x1e6   :  { %1263 = vmax.xlane.f32.xlu1 %v1262_v52 }
 0x1e7   :  { %v1259_v50 = vsel %vm1246_vm2, %v1166_v47, -inf }
 0x1e8   :  { %1260 = vmax.xlane.f32.xlu0 %v1259_v50 }
 0x1ea   :  { %1257 = vmax.xlane.f32.xlu2 %v1256_v53 }
 0x1f2   :  { %1254 = vmax.xlane.f32.xlu2 %v1253_v56 }
 0x1fc   :  { %3473 = vrot.lane.b32.xlu0 %v3472_v58, %s3774_s15 }
 0x1ff   :  { %3463 = vrot.lane.b32.xlu1 %v3472_v58, %s3776_s4 }
 0x20a   :  { %3468 = vrot.lane.b32.xlu2 %v3472_v58, %s3775_s16 }
 0x242   :  { %v1249_v48 = vpop.xlane.xlu0 %1248 }
 0x243   :  { %v1271_v49 = vsub.f32 %v1062_v36, %v1249_v48 }
 0x245   :  { %v1279_v60 = vmul.f32 1.442695, %v1271_v49 }
 0x247   :  { %3494 = vpow2.f32 %v1279_v60 }
 0x24a   :  { %v1252_v62 = vpop.xlane.xlu1 %1251 }
 0x24b   :  { %v1272_v63 = vsub.f32 %v1088_v41, %v1252_v62  ;;  %v820_v41 = vrot.slane %v4202_v59, 4 }
 0x24d   :  { %v4211_v26 = vpop.eup %3494  ;;  %v1281_v1 = vmul.f32 1.442695, %v1272_v63 }
 0x24e   :  { %v1295_v3 = vsel %vm1246_vm2, %v4211_v26, 0.0 }
 0x24f   :  { %3496 = vpow2.f32 %v1281_v1  ;;  %1296 = vadd.xlane.f32.xlu1 %v1295_v3 }
 0x253   :  { %v1270_v4 = vpop.xlane.xlu0 %1269 }
 0x254   :  { %v1278_v24 = vsub.f32 %v1244_v40, %v1270_v4 }
 0x255   :  { %v4215_v6 = vpop.eup %3496  ;;  %v1267_v2 = vpop.xlane.xlu2 %1266 }
 0x256   :  { %v1298_v7 = vsel %vm1246_vm2, %v4215_v6, 0.0  ;;  %v1277_v16 = vsub.f32 %v1218_v45, %v1267_v2  ;;  %v1293_v14 = vmul.f32 1.442695, %v1278_v24 }
 0x257   :  { %1299 = vadd.xlane.f32.xlu0 %v1298_v7 }
 0x258   :  { %v1291_v28 = vmul.f32 1.442695, %v1277_v16 }
 0x259   :  { %v1264_v23 = vpop.xlane.xlu1 %1263 }
 0x25a   :  { %v1276_v29 = vsub.f32 %v1192_v5, %v1264_v23 }
 0x25b   :  { %v1261_v8 = vpop.xlane.xlu0 %1260 }
 0x25c   :  { %v1275_v9 = vsub.f32 %v1166_v47, %v1261_v8  ;;  %v1289_v33 = vmul.f32 1.442695, %v1276_v29 }
 0x25d   :  { %v1258_v10 = vpop.xlane.xlu2 %1257 }
 0x25e   :  { %v1274_v22 = vsub.f32 %v1140_v42, %v1258_v10  ;;  %v1287_v27 = vmul.f32 1.442695, %v1275_v9 }
 0x260   :  { %v1285_v18 = vmul.f32 1.442695, %v1274_v22  ;;  %3498 = vpow2.f32 %v1287_v27 }
 0x262   :  { %3500 = vpow2.f32 %v1285_v18 }
 0x263   :  { %3502 = vpow2.f32 %v1293_v14 }
 0x264   :  { %3504 = vpow2.f32 %v1291_v28 }
 0x265   :  { %v1255_v31 = vpop.xlane.xlu2 %1254 }
 0x266   :  { %v4219_v11 = vpop.eup %3498  ;;  %v1273_v13 = vsub.f32 %v1114_v54, %v1255_v31 }
 0x267   :  { %v1307_v32 = vsel %vm1246_vm2, %v4219_v11, 0.0 }
 0x268   :  { %v4223_v21 = vpop.eup %3500  ;;  %v1283_v35 = vmul.f32 1.442695, %v1273_v13  ;;  %1308 = vadd.xlane.f32.xlu0 %v1307_v32 }
 0x269   :  { %v1304_v36 = vsel %vm1246_vm2, %v4223_v21, 0.0  ;;  %v4227_v37 = vpop.eup %3502 }
 0x26a   :  { %3506 = vpow2.f32 %v1283_v35  ;;  %1305 = vadd.xlane.f32.xlu1 %v1304_v36  ;;  %v4229_v25 = vpop.eup %3504  ;;  %v1316_v34 = vsel %vm1246_vm2, %v4227_v37, 0.0 }
 0x26b   :  { %3508 = vpow2.f32 %v1289_v33  ;;  %v1313_v50 = vsel %vm1246_vm2, %v4229_v25, 0.0 }
 0x26d   :  { %v3469_v15 = vpop.permute.xlu2 %3468 }
 0x26e   :  { %v3471_v0 = vunpack.i.h.bf16 %v3469_v15  ;;  %v3470_v39 = vunpack.i.l.bf16 %v3469_v15  ;;  %v3474_v40 = vpop.permute.xlu0 %3473 }
 0x26f   :  { %v3476_v44 = vunpack.i.h.bf16 %v3474_v40  ;;  %v3475_v45 = vunpack.i.l.bf16 %v3474_v40 }
 0x270   :  { %v4235_v20 = vpop.eup %3506  ;;  %v874_v61 = vrot.slane %v3471_v0, 4  ;;  %v877_v5 = vsel %vm338_vm1, %v3471_v0, %v876_v51  ;;  %v818_v46 = vrot.slane %v3470_v39, 4  ;;  %v821_v42 = vsel %vm338_vm1, %v3470_v39, %v820_v41  ;;  %1317 = vadd.xlane.f32.xlu0 %v1316_v34 }
 0x271   :  { %v885_v52 = vperm.slane %v877_v5, %v3923_v43  ;;  %v1301_v47 = vsel %vm1246_vm2, %v4235_v20, 0.0  ;;  %v3464_v53 = vpop.permute.xlu1 %3463  ;;  %v886_v54 = vrot.slane %v3476_v44, 4  ;;  %v4244_v56 = vpop.eup %3508  ;;  %v829_v63 = vperm.slane %v821_v42, %v3923_v43 }
 0x272   :  { %v875_v57 = vsel %vm338_vm1, %v874_v61, %v4204_v19  ;;  %v819_v58 = vsel %vm338_vm1, %v818_v46, %v4202_v59  ;;  %1302 = vadd.xlane.f32.xlu2 %v1301_v47  ;;  %1314 = vadd.xlane.f32.xlu1 %v1313_v50  ;;  %v3466_v48 = vunpack.i.h.bf16 %v3464_v53  ;;  %v3465_v49 = vunpack.i.l.bf16 %v3464_v53 }
 0x273   :  { %v881_v60 = vperm.slane %v875_v57, %v3923_v43  ;;  %v825_v62 = vperm.slane %v819_v58, %v3923_v43  ;;  %v830_v2 = vrot.slane %v3475_v45, 4  ;;  %v1310_v59 = vsel %vm1246_vm2, %v4244_v56, 0.0 }
 0x274   :  { %v888_v1 = vrot.slane %v3466_v48, 4  ;;  %v832_v3 = vrot.slane %v3465_v49, 4  ;;  %v887_v4 = vsel %vm338_vm1, %v886_v54, %v3466_v48  ;;  %v912_v8 = vrot.slane %v885_v52, 4 }
 0x275   :  { %v900_v7 = vrot.slane %v881_v60, 4  ;;  %v893_v19 = vperm.slane %v887_v4, %v3923_v43  ;;  %v831_v10 = vsel %vm338_vm1, %v830_v2, %v3465_v49  ;;  %v844_v23 = vrot.slane %v825_v62, 4 }
 0x276   :  { %v889_v9 = vsel %vm338_vm1, %v3476_v44, %v888_v1  ;;  %v833_v24 = vsel %vm338_vm1, %v3475_v45, %v832_v3  ;;  %v837_v18 = vperm.slane %v831_v10, %v3923_v43  ;;  %v856_v14 = vrot.slane %v829_v63, 4 }
 0x277   :  { %v897_v22 = vperm.slane %v889_v9, %v3923_v43  ;;  %v898_v27 = vrot.slane %v893_v19, 4  ;;  %v901_v16 = vsel %vm338_vm1, %v893_v19, %v900_v7  ;;  %v841_v29 = vperm.slane %v833_v24, %v3923_v43 }
 0x278   :  { %v909_v28 = vperm.slane %v901_v16, %v3933_v55  ;;  %v842_v33 = vrot.slane %v837_v18, 4  ;;  %v845_v41 = vsel %vm338_vm1, %v837_v18, %v844_v23 }
 0x279   :  { %v899_v31 = vsel %vm338_vm1, %v898_v27, %v881_v60  ;;  %v910_v13 = vrot.slane %v897_v22, 4  ;;  %v913_v32 = vsel %vm338_vm1, %v897_v22, %v912_v8  ;;  %v853_v39 = vperm.slane %v845_v41, %v3933_v55 }
 0x27a   :  { %v905_v35 = vperm.slane %v899_v31, %v3933_v55  ;;  %v921_v36 = vperm.slane %v913_v32, %v3933_v55  ;;  %v924_v15 = vrot.slane %v909_v28, 4  ;;  %1311 = vadd.xlane.f32.xlu2 %v1310_v59  ;;  %v843_v0 = vsel %vm338_vm1, %v842_v33, %v825_v62 }
 0x27b   :  { %v911_v51 = vsel %vm338_vm1, %v910_v13, %v885_v52  ;;  %v854_v40 = vrot.slane %v841_v29, 4  ;;  %v849_v61 = vperm.slane %v843_v0, %v3933_v55  ;;  %v857_v42 = vsel %vm338_vm1, %v841_v29, %v856_v14 }
 0x27c   :  { %v917_v44 = vperm.slane %v911_v51, %v3933_v55  ;;  %v925_v45 = vsel %vm338_vm1, 0.0, %v924_v15  ;;  %v928_v34 = vrot.slane %v921_v36, 4  ;;  %v868_v47 = vrot.slane %v853_v39, 4 }
 0x27d   :  { %v989_v5 = vrot.slane %v925_v45, 4  ;;  %v855_v46 = vsel %vm338_vm1, %v854_v40, %v829_v63  ;;  %v865_v58 = vperm.slane %v857_v42, %v3933_v55  ;;  %v866_v49 = vrot.slane %v849_v61, 4 }
 0x27e   :  { %v926_v50 = vrot.slane %v917_v44, 4  ;;  %v929_v52 = vsel %vm338_vm1, 0.0, %v928_v34  ;;  %v995_v53 = vsel %vm338_vm1, %v928_v34, %v917_v44  ;;  %v861_v54 = vperm.slane %v855_v46, %v3933_v55 }
 0x27f   :  { %v1000_v57 = vrot.slane %v929_v52, 4  ;;  %v869_v48 = vsel %vm338_vm1, 0.0, %v868_v47  ;;  %v930_v63 = vsel %vm338_vm1, %v868_v47, %v849_v61  ;;  %v922_v1 = vrot.slane %v905_v35, 4 }
 0x280   :  { %v870_v60 = vrot.slane %v861_v54, 4  ;;  %v935_v62 = vrot.slane %v869_v48, 4  ;;  %v872_v3 = vrot.slane %v865_v58, 4  ;;  %v867_v4 = vsel %vm338_vm1, 0.0, %v866_v49 }
 0x281   :  { %v934_v2 = vperm.slane %v930_v63, %v3923_v43  ;;  %v927_v7 = vsel %vm338_vm1, 0.0, %v926_v50  ;;  %v923_v8 = vsel %vm338_vm1, 0.0, %v922_v1  ;;  %v984_v9 = vsel %vm338_vm1, %v924_v15, %v905_v35 }
 0x282   :  { %v871_v19 = vsel %vm338_vm1, 0.0, %v870_v60  ;;  %v936_v59 = vsel %vm338_vm1, %v935_v62, %v867_v4  ;;  %v873_v10 = vsel %vm338_vm1, 0.0, %v872_v3  ;;  %v941_v24 = vsel %vm338_vm1, %v872_v3, %v861_v54 }
 0x283   :  { %v940_v22 = vperm.slane %v936_v59, %v3923_v43  ;;  %v954_v27 = vrot.slane %v934_v2, 4  ;;  %v946_v16 = vrot.slane %v873_v10, 4  ;;  %v945_v18 = vperm.slane %v941_v24, %v3923_v43 }
 0x284   :  { %v988_v23 = vperm.slane %v984_v9, %v3923_v43  ;;  %v990_v14 = vsel %vm338_vm1, %v989_v5, %v923_v8  ;;  %v999_v31 = vperm.slane %v995_v53, %v3923_v43  ;;  %v1001_v13 = vsel %vm338_vm1, %v1000_v57, %v927_v7 }
 0x285   :  { %v955_v28 = vsel %vm338_vm1, %v940_v22, %v954_v27  ;;  %v994_v29 = vperm.slane %v990_v14, %v3923_v43  ;;  %v947_v32 = vsel %vm338_vm1, %v946_v16, %v871_v19  ;;  %v966_v35 = vrot.slane %v945_v18, 4 }
 0x286   :  { %v963_v33 = vperm.slane %v955_v28, %v3933_v55  ;;  %v1005_v36 = vperm.slane %v1001_v13, %v3923_v43  ;;  %v951_v15 = vperm.slane %v947_v32, %v3923_v43  ;;  %v1008_v41 = vrot.slane %v988_v23, 4 }
 0x287   :  { %v1020_v51 = vrot.slane %v999_v31, 4  ;;  %v952_v0 = vrot.slane %v940_v22, 4  ;;  %v1006_v40 = vrot.slane %v994_v29, 4 }
 0x288   :  { %v982_v39 = vrot.slane %v963_v33, 4  ;;  %v1018_v44 = vrot.slane %v1005_v36, 4  ;;  %v967_v45 = vsel %vm338_vm1, %v951_v15, %v966_v35  ;;  %v1009_v34 = vsel %vm338_vm1, %v994_v29, %v1008_v41 }
 0x289   :  { %v1021_v61 = vsel %vm338_vm1, %v1005_v36, %v1020_v51  ;;  %v953_v5 = vsel %vm338_vm1, %v952_v0, %v934_v2  ;;  %v975_v46 = vperm.slane %v967_v45, %v3933_v55  ;;  %v1017_v42 = vperm.slane %v1009_v34, %v3933_v55 }
 0x28a   :  { %v1029_v47 = vperm.slane %v1021_v61, %v3933_v55  ;;  %v959_v50 = vperm.slane %v953_v5, %v3933_v55  ;;  %v964_v52 = vrot.slane %v951_v15, 4  ;;  %v1007_v53 = vsel %vm338_vm1, %v1006_v40, %v988_v23 }
 0x28b   :  { %v1019_v54 = vsel %vm338_vm1, %v1018_v44, %v999_v31  ;;  %v980_v57 = vrot.slane %v975_v46, 4  ;;  %v983_v58 = vsel %vm338_vm1, %v975_v46, %v982_v39  ;;  %v1036_v49 = vrot.slane %v1017_v42, 4 }
 0x28c   :  { %v1034_v48 = vrot.slane %v1029_v47, 4  ;;  %1446 = vmatpush.msrb.mxu1 %v983_v58  ;;  %v965_v60 = vsel %vm338_vm1, %v964_v52, %v945_v18  ;;  %v978_v62 = vrot.slane %v959_v50, 4  ;;  %v1013_v63 = vperm.slane %v1007_v53, %v3933_v55 }
 0x28d   :  { %v1025_v1 = vperm.slane %v1019_v54, %v3933_v55  ;;  %v981_v3 = vsel %vm338_vm1, %v980_v57, %v963_v33  ;;  %v1037_v2 = vsel %vm338_vm1, %v1029_v47, %v1036_v49  ;;  %v971_v7 = vperm.slane %v965_v60, %v3933_v55 }
 0x28e   :  { %v1035_v4 = vsel %vm338_vm1, %v1034_v48, %v1017_v42  ;;  %1423 = vmatpush.msra.mxu0 %v981_v3  ;;  %1538 = vmatpush.msra.mxu1 %v1037_v2  ;;  %v1032_v59 = vrot.slane %v1013_v63, 4 }
 0x28f   :  { %v1030_v19 = vrot.slane %v1025_v1, 4  ;;  %v976_v8 = vrot.slane %v971_v7, 4  ;;  %v979_v9 = vsel %vm338_vm1, %v971_v7, %v978_v62 }
 0x290   :  { %1515 = vmatpush.msrb.mxu0 %v1035_v4  ;;  %1400 = vmatpush.msrb.mxu3 %v979_v9  ;;  %v1033_v24 = vsel %vm338_vm1, %v1025_v1, %v1032_v59 }
 0x291   :  { %v1031_v10 = vsel %vm338_vm1, %v1030_v19, %v1013_v63  ;;  %v977_v22 = vsel %vm338_vm1, %v976_v8, %v959_v50 }
 0x292   :  { %1492 = vmatpush.msra.mxu3 %v1033_v24  ;;  %1377 = vmatpush.msra.mxu2 %v977_v22 }
 0x294   :  { %1469 = vmatpush.msrb.mxu2 %v1031_v10 }
 0x2c2   :  { %v1297_v27 = vpop.xlane.xlu1 %1296 }
 0x2c3   :  { %3510 = vrcp.f32 %v1297_v27 }
 0x2c9   :  { %v3511_v16 = vpop.eup %3510 }
 0x2ca   :  { %v1327_v18 = vmul.f32 %v3511_v16, %v1297_v27  ;;  %v1300_v23 = vpop.xlane.xlu0 %1299 }
 0x2cb   :  { %3512 = vrcp.f32 %v1300_v23 }
 0x2cc   :  { %v1335_v14 = vsub.f32 2.0, %v1327_v18 }
 0x2ce   :  { %v1343_v28 = vmul.f32 %v3511_v16, %v1335_v14 }
 0x2d0   :  { %v1351_v29 = vmul.f32 %v4211_v26, %v1343_v28 }
 0x2d1   :  { %v3513_v31 = vpop.eup %3512 }
 0x2d2   :  { %v1328_v13 = vmul.f32 %v3513_v31, %v1300_v23  ;;  %3407 = vmatmul.msk.f32.vlgmr.msra.gmra.mxu2 %vm1246_vm2, %v1351_v29 }
 0x2d4   :  { %v1336_v32 = vsub.f32 2.0, %v1328_v13 }
 0x2d6   :  { %v1344_v33 = vmul.f32 %v3513_v31, %v1336_v32 }
 0x2d8   :  { %v1352_v35 = vmul.f32 %v4215_v6, %v1344_v33 }
 0x2da   :  { %3408 = vmatmul.msk.f32.vlgmr.msrb.gmra.mxu3 %vm1246_vm2, %v1352_v35 }
 0x2db   :  { %v1309_v36 = vpop.xlane.xlu0 %1308 }
 0x2dc   :  { %3514 = vrcp.f32 %v1309_v36 }
 0x2dd   :  { %v1306_v15 = vpop.xlane.xlu1 %1305 }
 0x2de   :  { %3516 = vrcp.f32 %v1306_v15 }
 0x2e2   :  { %v3515_v41 = vpop.eup %3514 }
 0x2e3   :  { %v1331_v51 = vmul.f32 %v3515_v41, %v1309_v36  ;;  %v1318_v0 = vpop.xlane.xlu0 %1317 }
 0x2e4   :  { %v3517_v39 = vpop.eup %3516  ;;  %3518 = vrcp.f32 %v1318_v0 }
 0x2e5   :  { %v1330_v26 = vmul.f32 %v3517_v39, %v1306_v15  ;;  %v1339_v40 = vsub.f32 2.0, %v1331_v51  ;;  %v1303_v44 = vpop.xlane.xlu2 %1302  ;;  %v1315_v45 = vpop.xlane.xlu1 %1314 }
 0x2e6   :  { %3520 = vrcp.f32 %v1303_v44 }
 0x2e7   :  { %v1338_v34 = vsub.f32 2.0, %v1330_v26  ;;  %v1347_v61 = vmul.f32 %v3515_v41, %v1339_v40  ;;  %3522 = vrcp.f32 %v1315_v45 }
 0x2e9   :  { %v1346_v6 = vmul.f32 %v3517_v39, %v1338_v34  ;;  %v1355_v5 = vmul.f32 %v4219_v11, %v1347_v61 }
 0x2ea   :  { %v3519_v46 = vpop.eup %3518 }
 0x2eb   :  { %v1354_v42 = vmul.f32 %v4223_v21, %v1346_v6  ;;  %v1334_v47 = vmul.f32 %v3519_v46, %v1318_v0  ;;  %3411 = vmatmul.msk.f32.vlgmr.msrb.gmra.mxu2 %vm1246_vm2, %v1355_v5 }
 0x2ec   :  { %v3521_v50 = vpop.eup %3520 }
 0x2ed   :  { %v3523_v52 = vpop.eup %3522  ;;  %v1329_v53 = vmul.f32 %v3521_v50, %v1303_v44  ;;  %v1342_v54 = vsub.f32 2.0, %v1334_v47  ;;  %v1312_v57 = vpop.xlane.xlu2 %1311  ;;  %3410 = vmatmul.msk.f32.vlgmr.msrb.gmra.mxu1 %vm1246_vm2, %v1354_v42 }
 0x2ee   :  { %3524 = vrcp.f32 %v1312_v57  ;;  %v1333_v48 = vmul.f32 %v3523_v52, %v1315_v45 }
 0x2ef   :  { %v1337_v58 = vsub.f32 2.0, %v1329_v53  ;;  %v1350_v49 = vmul.f32 %v3519_v46, %v1342_v54 }
 0x2f0   :  { %v1341_v21 = vsub.f32 2.0, %v1333_v48 }
 0x2f1   :  { %v1345_v60 = vmul.f32 %v3521_v50, %v1337_v58  ;;  %v1358_v11 = vmul.f32 %v4227_v37, %v1350_v49 }
 0x2f2   :  { %v1349_v3 = vmul.f32 %v3523_v52, %v1341_v21 }
 0x2f3   :  { %v1353_v62 = vmul.f32 %v4235_v20, %v1345_v60 }
 0x2f4   :  { %v3525_v63 = vpop.eup %3524  ;;  %v1357_v7 = vmul.f32 %v4229_v25, %v1349_v3 }
 0x2f5   :  { %v1332_v1 = vmul.f32 %v3525_v63, %v1312_v57  ;;  %3409 = vmatmul.msk.f32.vlgmr.msra.gmra.mxu0 %vm1246_vm2, %v1353_v62  ;;  %3414 = vmatmul.msk.f32.vlgmr.msra.gmra.mxu1 %vm1246_vm2, %v1358_v11 }
 0x2f7   :  { %v1340_v4 = vsub.f32 2.0, %v1332_v1 }
 0x2f9   :  { %v1348_v2 = vmul.f32 %v3525_v63, %v1340_v4 }
 0x2fb   :  { %v1356_v19 = vmul.f32 %v4244_v56, %v1348_v2 }
 0x2fd   :  { %3412 = vmatmul.msk.f32.vlgmr.msra.gmra.mxu3 %vm1246_vm2, %v1356_v19  ;;  %3413 = vmatmul.msk.f32.vlgmr.msrb.gmra.mxu0 %vm1246_vm2, %v1357_v7 }
 0x355   :  { %v1379_v10 = vpop.f32.mrf.mxu2 }
 0x356   :  { %v1545_v27 = vrot.slane %v1379_v10, 4 }
 0x35d   :  { %v1402_v37 = vpop.f32.mrf.mxu3 }
 0x35e   :  { %v1557_v59 = vrot.slane %v1402_v37, 4 }
 0x36a   :  { %v1448_v20 = vpop.f32.mrf.mxu1 }
 0x36b   :  { %v1555_v8 = vrot.slane %v1448_v20, 4  ;;  %v1558_v9 = vsel %vm338_vm1, %v1448_v20, %v1557_v59  ;;  %v1810_v20 = vld [vmem:[#allocation11 + $0x78] sm:$0xff]  ;;  %v1809_v59 = vld [vmem:[#allocation11 + $0x70] sm:$0xff] }
 0x36c   :  { %v1566_v22 = vperm.slane %v1558_v9, %v3923_v43  ;;  %1815 = vmatpush.msra.mxu2 %v1810_v20 }
 0x36d   :  { %v1556_v24 = vsel %vm338_vm1, %v1555_v8, %v1402_v37 }
 0x36e   :  { %v1562_v25 = vperm.slane %v1556_v24, %v3923_v43  ;;  %v1579_v23 = vrot.slane %v1566_v22, 4  ;;  %v1471_v35 = vpop.f32.mrf.mxu2  ;;  %1816 = vmatpush.msra.mxu2 %v1809_v59 }
 0x36f   :  { %v1601_v44 = vrot.slane %v1471_v35, 4 }
 0x370   :  { %v1567_v29 = vrot.slane %v1562_v25, 4 }
 0x372   :  { %v1425_v16 = vpop.f32.mrf.mxu0  ;;  %v1540_v39 = vpop.f32.mrf.mxu1 }
 0x373   :  { %v1543_v56 = vrot.slane %v1425_v16, 4  ;;  %v1546_v18 = vsel %vm338_vm1, %v1425_v16, %v1545_v27  ;;  %v1611_v5 = vrot.slane %v1540_v39, 4 }
 0x374   :  { %v1554_v14 = vperm.slane %v1546_v18, %v3923_v43 }
 0x375   :  { %v1544_v28 = vsel %vm338_vm1, %v1543_v56, %v1379_v10  ;;  %v1808_v56 = vld [vmem:[#allocation11 + $0x68] sm:$0xff] }
 0x376   :  { %v1550_v31 = vperm.slane %v1544_v28, %v3923_v43  ;;  %v1580_v13 = vsel %vm338_vm1, %v1579_v23, %v1554_v14  ;;  %v1581_v32 = vrot.slane %v1554_v14, 4  ;;  %1817 = vmatpush.msra.mxu2 %v1808_v56 }
 0x377   :  { %v1586_v33 = vperm.slane %v1580_v13, %v3933_v55 }
 0x378   :  { %v1568_v36 = vsel %vm338_vm1, %v1567_v29, %v1550_v31  ;;  %v1569_v15 = vrot.slane %v1550_v31, 4  ;;  %v1582_v41 = vsel %vm338_vm1, %v1566_v22, %v1581_v32 }
 0x379   :  { %v1574_v51 = vperm.slane %v1568_v36, %v3933_v55  ;;  %v1590_v0 = vperm.slane %v1582_v41, %v3933_v55  ;;  %v1595_v40 = vrot.slane %v1586_v33, 4 }
 0x37a   :  { %v1570_v26 = vsel %vm338_vm1, %v1562_v25, %v1569_v15  ;;  %v1517_v45 = vpop.f32.mrf.mxu0 }
 0x37b   :  { %v1578_v34 = vperm.slane %v1570_v26, %v3933_v55  ;;  %v1591_v61 = vrot.slane %v1574_v51, 4  ;;  %v1597_v6 = vrot.slane %v1590_v0, 4  ;;  %v1599_v46 = vrot.slane %v1517_v45, 4 }
 0x37c   :  { %v1602_v42 = vsel %vm338_vm1, %v1517_v45, %v1601_v44  ;;  %v1596_v54 = vsel %vm338_vm1, 0.0, %v1595_v40 }
 0x37d   :  { %v1593_v47 = vrot.slane %v1578_v34, 4  ;;  %v1598_v50 = vsel %vm338_vm1, 0.0, %v1597_v6  ;;  %v1666_v52 = vsel %vm338_vm1, %v1597_v6, %v1586_v33  ;;  %v1610_v53 = vperm.slane %v1602_v42, %v3923_v43  ;;  %v1807_v33 = vld [vmem:[#allocation11 + $0x60] sm:$0xff] }
 0x37e   :  { %v1670_v57 = vperm.slane %v1666_v52, %v3923_v43  ;;  %v1671_v58 = vrot.slane %v1598_v50, 4  ;;  %v1600_v48 = vsel %vm338_vm1, %v1599_v46, %v1471_v35  ;;  %v1592_v11 = vsel %vm338_vm1, 0.0, %v1591_v61  ;;  %1818 = vmatpush.msra.mxu2 %v1807_v33  ;;  %v1806_v33 = vld [vmem:[#allocation11 + $0x58] sm:$0xff] }
 0x37f   :  { %v1594_v49 = vsel %vm338_vm1, 0.0, %v1593_v47  ;;  %v1606_v60 = vperm.slane %v1600_v48, %v3923_v43  ;;  %v1655_v62 = vsel %vm338_vm1, %v1593_v47, %v1574_v51  ;;  %v1637_v2 = vrot.slane %v1610_v53, 4 }
 0x380   :  { %v1672_v21 = vsel %vm338_vm1, %v1671_v58, %v1596_v54  ;;  %v1494_v63 = vpop.f32.mrf.mxu3  ;;  %v1659_v1 = vperm.slane %v1655_v62, %v3923_v43  ;;  %v1660_v3 = vrot.slane %v1594_v49, 4  ;;  %v1691_v4 = vrot.slane %v1670_v57, 4  ;;  %1819 = vmatpush.msra.mxu2 %v1806_v33 }
 0x381   :  { %v1612_v7 = vsel %vm338_vm1, %v1611_v5, %v1494_v63  ;;  %v1613_v19 = vrot.slane %v1494_v63, 4  ;;  %v1676_v37 = vperm.slane %v1672_v21, %v3923_v43  ;;  %v1625_v8 = vrot.slane %v1606_v60, 4 }
 0x382   :  { %v1618_v9 = vperm.slane %v1612_v7, %v3923_v43  ;;  %v1661_v10 = vsel %vm338_vm1, %v1660_v3, %v1592_v11  ;;  %v1679_v24 = vrot.slane %v1659_v1, 4 }
 0x383   :  { %v1614_v22 = vsel %vm338_vm1, %v1540_v39, %v1613_v19  ;;  %v1665_v27 = vperm.slane %v1661_v10, %v3923_v43  ;;  %v1692_v25 = vsel %vm338_vm1, %v1676_v37, %v1691_v4  ;;  %v1689_v16 = vrot.slane %v1676_v37, 4 }
 0x384   :  { %v1622_v18 = vperm.slane %v1614_v22, %v3923_v43  ;;  %v1623_v23 = vrot.slane %v1618_v9, 4  ;;  %v1626_v14 = vsel %vm338_vm1, %v1618_v9, %v1625_v8  ;;  %v1700_v28 = vperm.slane %v1692_v25, %v3933_v55 }
 0x385   :  { %v1634_v29 = vperm.slane %v1626_v14, %v3933_v55  ;;  %v1680_v31 = vsel %vm338_vm1, %v1665_v27, %v1679_v24  ;;  %v1677_v13 = vrot.slane %v1665_v27, 4  ;;  %v1690_v32 = vsel %vm338_vm1, %v1689_v16, %v1670_v57 }
 0x386   :  { %v1624_v35 = vsel %vm338_vm1, %v1623_v23, %v1606_v60  ;;  %v1635_v36 = vrot.slane %v1622_v18, 4  ;;  %v1638_v15 = vsel %vm338_vm1, %v1622_v18, %v1637_v2  ;;  %v1688_v41 = vperm.slane %v1680_v31, %v3933_v55 }
 0x387   :  { %v1630_v51 = vperm.slane %v1624_v35, %v3933_v55  ;;  %v1646_v0 = vperm.slane %v1638_v15, %v3933_v55  ;;  %v1649_v39 = vrot.slane %v1634_v29, 4  ;;  %v1705_v26 = vrot.slane %v1700_v28, 4  ;;  %v1805_v35 = vld [vmem:[#allocation11 + $0x50] sm:$0xff]  ;;  %v1803_v15 = vld [vmem:[#allocation11 + $0x40] sm:$0xff] }
 0x388   :  { %v1636_v40 = vsel %vm338_vm1, %v1635_v36, %v1610_v53  ;;  %v1707_v44 = vrot.slane %v1688_v41, 4  ;;  %v1678_v45 = vsel %vm338_vm1, %v1677_v13, %v1659_v1  ;;  %v1696_v34 = vperm.slane %v1690_v32, %v3933_v55  ;;  %v1804_v36 = vld [vmem:[#allocation11 + $0x48] sm:$0xff]  ;;  %1820 = vmatpush.msra.mxu2 %v1805_v35 }
 0x389   :  { %v1642_v61 = vperm.slane %v1636_v40, %v3933_v55  ;;  %v1647_v6 = vrot.slane %v1630_v51, 4  ;;  %v1650_v5 = vsel %vm338_vm1, 0.0, %v1649_v39  ;;  %v1653_v46 = vrot.slane %v1646_v0, 4  ;;  %v1800_v0 = vld [vmem:[#allocation11 + $0x28] sm:$0xff]  ;;  %v1797_v40 = vld [vmem:[#allocation11 + $0x10] sm:$0xff] }
 0x38a   :  { %v1709_v42 = vsel %vm338_vm1, %v1649_v39, %v1630_v51  ;;  %v1714_v47 = vrot.slane %v1650_v5, 4  ;;  %v1706_v50 = vsel %vm338_vm1, %v1705_v26, %v1688_v41  ;;  %v1708_v52 = vsel %vm338_vm1, %v1700_v28, %v1707_v44  ;;  %1821 = vmatpush.msra.mxu2 %v1804_v36  ;;  %v1802_v41 = vld [vmem:[#allocation11 + $0x38] sm:$0xff]  ;;  %v1801_v51 = vld [vmem:[#allocation11 + $0x30] sm:$0xff]  ;;  %v1799_v39 = vld [vmem:[#allocation11 + $0x20] sm:$0xff] }
 0x38b   :  { %v1648_v53 = vsel %vm338_vm1, 0.0, %v1647_v6  ;;  %v1651_v54 = vrot.slane %v1642_v61, 4  ;;  %v1654_v57 = vsel %vm338_vm1, 0.0, %v1653_v46  ;;  %v1713_v58 = vperm.slane %v1709_v42, %v3923_v43  ;;  %1773 = vrot.lane.b32.xlu1 %v1706_v50, %s3775_s16  ;;  %1781 = vrot.lane.b32.xlu0 %v1708_v52, %s3776_s4  ;;  %v1798_v26 = vld [vmem:[#allocation11 + $0x18] sm:$0xff]  ;;  %v1796_v44 = vld [vmem:[#allocation11 + $0x8] sm:$0xff] }
 0x38c   :  { %v1725_v48 = vrot.slane %v1654_v57, 4  ;;  %v1684_v49 = vperm.slane %v1678_v45, %v3933_v55  ;;  %v1701_v60 = vrot.slane %v1696_v34, 4  ;;  %v1715_v11 = vsel %vm338_vm1, %v1714_v47, %v1648_v53  ;;  %1822 = vmatpush.msra.mxu2 %v1803_v15  ;;  %v1795_v45 = vld [vmem:[#allocation11] sm:$0xff] }
 0x38d   :  { %v1652_v62 = vsel %vm338_vm1, 0.0, %v1651_v54  ;;  %v1719_v21 = vperm.slane %v1715_v11, %v3923_v43  ;;  %v1720_v63 = vsel %vm338_vm1, %v1653_v46, %v1642_v61  ;;  %v1733_v1 = vrot.slane %v1713_v58, 4 }
 0x38e   :  { %v1703_v3 = vrot.slane %v1684_v49, 4  ;;  %v1724_v4 = vperm.slane %v1720_v63, %v3923_v43  ;;  %v1726_v2 = vsel %vm338_vm1, %v1725_v48, %v1652_v62  ;;  %v1702_v7 = vsel %vm338_vm1, %v1701_v60, %v1684_v49  ;;  %1823 = vmatpush.msra.mxu2 %v1802_v41 }
 0x38f   :  { %v1730_v19 = vperm.slane %v1726_v2, %v3923_v43  ;;  %v1734_v37 = vsel %vm338_vm1, %v1719_v21, %v1733_v1  ;;  %v1731_v20 = vrot.slane %v1719_v21, 4  ;;  %v2102_v62 = vrot.slane %v4186_v38, 4 }
 0x390   :  { %v1704_v59 = vsel %vm338_vm1, %v1696_v34, %v1703_v3  ;;  %v1742_v8 = vperm.slane %v1734_v37, %v3933_v55  ;;  %v1745_v9 = vrot.slane %v1724_v4, 4  ;;  %1824 = vmatpush.msra.mxu2 %v1801_v51 }
 0x391   :  { %1765 = vrot.lane.b32.xlu2 %v1704_v59, %s3774_s15  ;;  %v1732_v10 = vsel %vm338_vm1, %v1731_v20, %v1713_v58  ;;  %v1743_v24 = vrot.slane %v1730_v19, 4 }
 0x392   :  { %v1746_v22 = vsel %vm338_vm1, %v1730_v19, %v1745_v9  ;;  %v1761_v27 = vrot.slane %v1742_v8, 4  ;;  %v1738_v25 = vperm.slane %v1732_v10, %v3933_v55  ;;  %1825 = vmatpush.msra.mxu2 %v1800_v0 }
 0x393   :  { %v1754_v16 = vperm.slane %v1746_v22, %v3933_v55  ;;  %v1744_v56 = vsel %vm338_vm1, %v1743_v24, %v1724_v4 }
 0x394   :  { %v1750_v18 = vperm.slane %v1744_v56, %v3933_v55  ;;  %v1757_v23 = vrot.slane %v1738_v25, 4  ;;  %1826 = vmatpush.msra.mxu2 %v1799_v39 }
 0x395   :  { %v1762_v14 = vsel %vm338_vm1, %v1754_v16, %v1761_v27  ;;  %v1759_v28 = vrot.slane %v1754_v16, 4 }
 0x396   :  { %1783 = vrot.lane.b32.xlu1 %v1762_v14, %s3776_s4  ;;  %v1755_v29 = vrot.slane %v1750_v18, 4  ;;  %v1758_v31 = vsel %vm338_vm1, %v1750_v18, %v1757_v23  ;;  %1827 = vmatpush.msra.mxu2 %v1798_v26 }
 0x397   :  { %v1760_v13 = vsel %vm338_vm1, %v1759_v28, %v1742_v8 }
 0x398   :  { %1775 = vrot.lane.b32.xlu0 %v1760_v13, %s3775_s16  ;;  %v1756_v32 = vsel %vm338_vm1, %v1755_v29, %v1738_v25  ;;  %1828 = vmatpush.msra.mxu2 %v1797_v40 }
 0x399   :  { %1767 = vrot.lane.b32.xlu2 %v1758_v31, %s3774_s15 }
 0x39a   :  { %1829 = vmatpush.msra.mxu2 %v1796_v44 }
 0x39c   :  { %1830 = vmatpush.msra.mxu2 %v1795_v45 }
 0x39e   :  { %2094 = vrot.lane.b32.xlu1 %v4186_v38, %s3774_s15 }
 0x3a0   :  { %2088 = vrot.lane.b32.xlu0 %v4186_v38, %s3775_s16 }
 0x3a1   :  { %2082 = vrot.lane.b32.xlu2 %v4186_v38, %s3776_s4 }
 0x3eb   :  { %v1766_v34 = vpop.permute.xlu2 %1765 }
 0x3ec   :  { %v1787_v61 = vsel %vm167_vm0, %v1702_v7, %v1766_v34 }
 0x3f3   :  { %v1768_v47 = vpop.permute.xlu2 %1767 }
 0x3f4   :  { %v1788_v52 = vsel %vm167_vm0, %v1756_v32, %v1768_v47 }
 0x3fb   :  { %v2083_v57 = vpop.permute.xlu2 %2082 }
 0x3fc   :  { %v2114_v48 = vrot.slane %v2083_v57, 4 }
 0x3fd   :  { %v1774_v6 = vpop.permute.xlu1 %1773  ;;  %v1782_v5 = vpop.permute.xlu0 %1781 }
 0x3fe   :  { %v1790_v46 = vsel %vm1789_vm3, %v1787_v61, %v1774_v6 }
 0x3ff   :  { %v1793_v42 = vsel %vm1792_vm4, %v1790_v46, %v1782_v5 }
 0x400   :  { %1831 = vmatmul.f32.vlgmr.msra.gmra.mxu2 %v1793_v42 }
 0x408   :  { %v1784_v50 = vpop.permute.xlu1 %1783 }
 0x40a   :  { %v1776_v53 = vpop.permute.xlu0 %1775 }
 0x40b   :  { %v1791_v54 = vsel %vm1789_vm3, %v1788_v52, %v1776_v53 }
 0x40c   :  { %v1794_v58 = vsel %vm1792_vm4, %v1791_v54, %v1784_v50 }
 0x40d   :  { %1834 = vmatmul.f32.gmra.mxu2 %v1794_v58 }
 0x410   :  { %v2095_v49 = vpop.permute.xlu1 %2094 }
 0x411   :  { %v2112_v60 = vrot.slane %v2095_v49, 4  ;;  %v2115_v11 = vsel %vm338_vm1, %v2095_v49, %v2114_v48 }
 0x412   :  { %v2123_v21 = vperm.slane %v2115_v11, %v3923_v43  ;;  %v2089_v63 = vpop.permute.xlu0 %2088 }
 0x413   :  { %v2113_v1 = vsel %vm338_vm1, %v2112_v60, %v2083_v57  ;;  %v2100_v3 = vrot.slane %v2089_v63, 4  ;;  %v2103_v4 = vsel %vm338_vm1, %v2089_v63, %v2102_v62 }
 0x414   :  { %v2119_v2 = vperm.slane %v2113_v1, %v3923_v43  ;;  %v2136_v7 = vrot.slane %v2123_v21, 4  ;;  %v2111_v19 = vperm.slane %v2103_v4, %v3923_v43 }
 0x415   :  { %v2101_v37 = vsel %vm338_vm1, %v2100_v3, %v4186_v38 }
 0x416   :  { %v2124_v20 = vrot.slane %v2119_v2, 4  ;;  %v2107_v59 = vperm.slane %v2101_v37, %v3923_v43  ;;  %v2137_v8 = vsel %vm338_vm1, %v2136_v7, %v2111_v19  ;;  %v2138_v9 = vrot.slane %v2111_v19, 4 }
 0x417   :  { %v2143_v10 = vperm.slane %v2137_v8, %v3933_v55 }
 0x418   :  { %v2125_v24 = vsel %vm338_vm1, %v2124_v20, %v2107_v59  ;;  %v2126_v22 = vrot.slane %v2107_v59, 4  ;;  %v2139_v27 = vsel %vm338_vm1, %v2123_v21, %v2138_v9  ;;  %v3492_v21 = vld [vmem:[%s4913_s8] ss:$0 sm:$0xff] }
 0x419   :  { %v2131_v25 = vperm.slane %v2125_v24, %v3933_v55  ;;  %v2147_v16 = vperm.slane %v2139_v27, %v3933_v55  ;;  %v2152_v18 = vrot.slane %v2143_v10, 4 }
 0x41a   :  { %v2127_v56 = vsel %vm338_vm1, %v2119_v2, %v2126_v22 }
 0x41b   :  { %v2135_v38 = vperm.slane %v2127_v56, %v3933_v55  ;;  %v2154_v23 = vrot.slane %v2147_v16, 4  ;;  %v2148_v14 = vrot.slane %v2131_v25, 4  ;;  %v2153_v35 = vsel %vm338_vm1, 0.0, %v2152_v18 }
 0x41d   :  { %v2150_v28 = vrot.slane %v2135_v38, 4  ;;  %v2155_v29 = vsel %vm338_vm1, 0.0, %v2154_v23  ;;  %v2223_v31 = vsel %vm338_vm1, %v2154_v23, %v2143_v10  ;;  %v2149_v39 = vsel %vm338_vm1, 0.0, %v2148_v14 }
 0x41e   :  { %v2227_v13 = vperm.slane %v2223_v31, %v3923_v43  ;;  %v2228_v32 = vrot.slane %v2155_v29, 4 }
 0x41f   :  { %v2151_v33 = vsel %vm338_vm1, 0.0, %v2150_v28  ;;  %v2212_v36 = vsel %vm338_vm1, %v2150_v28, %v2131_v25 }
 0x420   :  { %v2217_v15 = vrot.slane %v2151_v33, 4  ;;  %v2229_v41 = vsel %vm338_vm1, %v2228_v32, %v2153_v35  ;;  %v2248_v51 = vrot.slane %v2227_v13, 4  ;;  %v2216_v0 = vperm.slane %v2212_v36, %v3923_v43 }
 0x421   :  { %v2233_v26 = vperm.slane %v2229_v41, %v3923_v43 }
 0x422   :  { %v2218_v40 = vsel %vm338_vm1, %v2217_v15, %v2149_v39  ;;  %v2236_v44 = vrot.slane %v2216_v0, 4  ;;  %v2158_v15 = vrot.slane %v4188_v30, 4 }
 0x423   :  { %v2246_v45 = vrot.slane %v2233_v26, 4  ;;  %v2222_v34 = vperm.slane %v2218_v40, %v3923_v43  ;;  %v2249_v61 = vsel %vm338_vm1, %v2233_v26, %v2248_v51 }
 0x424   :  { %v2257_v6 = vperm.slane %v2249_v61, %v3933_v55 }
 0x425   :  { %v2237_v5 = vsel %vm338_vm1, %v2222_v34, %v2236_v44  ;;  %v2234_v46 = vrot.slane %v2222_v34, 4  ;;  %v2247_v42 = vsel %vm338_vm1, %v2246_v45, %v2227_v13 }
 0x426   :  { %v2245_v47 = vperm.slane %v2237_v5, %v3933_v55  ;;  %v2262_v50 = vrot.slane %v2257_v6, 4  ;;  %v2253_v52 = vperm.slane %v2247_v42, %v3933_v55 }
 0x427   :  { %v2235_v53 = vsel %vm338_vm1, %v2234_v46, %v2216_v0 }
 0x428   :  { %v2263_v54 = vsel %vm338_vm1, %v2262_v50, %v2245_v47  ;;  %v2241_v57 = vperm.slane %v2235_v53, %v3933_v55  ;;  %v2258_v58 = vrot.slane %v2253_v52, 4  ;;  %v2264_v48 = vrot.slane %v2245_v47, 4 }
 0x429   :  { %3419 = vmatpush.xpose.msk.msrb.mxu1 %vm167_vm0, %v2263_v54 }
 0x42a   :  { %v2259_v49 = vsel %vm338_vm1, %v2258_v58, %v2241_v57  ;;  %v2265_v60 = vsel %vm338_vm1, %v2257_v6, %v2264_v48  ;;  %v2260_v11 = vrot.slane %v2241_v57, 4 }
 0x42b   :  { %3415 = vmatpush.xpose.msk.msrb.mxu3 %vm167_vm0, %v2259_v49 }
 0x42c   :  { %v2261_v62 = vsel %vm338_vm1, %v2253_v52, %v2260_v11 }
 0x42d   :  { %3417 = vmatpush.xpose.msk.msra.mxu0 %vm167_vm0, %v2261_v62 }
 0x42f   :  { %3421 = vmatpush.xpose.msk.msra.mxu3 %vm167_vm0, %v2265_v60 }
 0x483   :  { %v1832_v63 = vpop.f32.mrf.mxu2 }
 0x484   :  { %v1833_v1 = vadd.f32 %v3492_v21, %v1832_v63 }
 0x486   :  { %v1838_v3 = vmul.f32 0.35355338, %v1833_v1 }
 0x488   :  { %1854 = vrot.lane.b32.xlu1 %v1838_v3, %s3774_s15  ;;  %1848 = vrot.lane.b32.xlu0 %v1838_v3, %s3775_s16  ;;  %v1862_v59 = vrot.slane %v1838_v3, 4 }
 0x489   :  { %1842 = vrot.lane.b32.xlu2 %v1838_v3, %s3776_s4 }
 0x490   :  { %2096 = vrot.lane.b32.xlu1 %v4188_v30, %s3774_s15  ;;  %2090 = vrot.lane.b32.xlu0 %v4188_v30, %s3775_s16  ;;  %v1835_v4 = vpop.f32.mrf.mxu2 }
 0x491   :  { %2084 = vrot.lane.b32.xlu2 %v4188_v30, %s3776_s4  ;;  %v1836_v2 = vadd.f32 %v3492_v21, %v1835_v4 }
 0x493   :  { %v4499_v7 = vmul.f32 0.35355338, %v1836_v2 }
 0x495   :  { %v1918_v40 = vrot.slane %v4499_v7, 4 }
 0x498   :  { %1856 = vrot.lane.b32.xlu1 %v4499_v7, %s3774_s15  ;;  %1850 = vrot.lane.b32.xlu0 %v4499_v7, %s3775_s16 }
 0x499   :  { %1844 = vrot.lane.b32.xlu2 %v4499_v7, %s3776_s4 }
 0x4e3   :  { %v1843_v19 = vpop.permute.xlu2 %1842 }
 0x4e4   :  { %v1874_v20 = vrot.slane %v1843_v19, 4 }
 0x4eb   :  { %v2085_v37 = vpop.permute.xlu2 %2084 }
 0x4ec   :  { %v2170_v41 = vrot.slane %v2085_v37, 4 }
 0x4f3   :  { %v1845_v33 = vpop.permute.xlu2 %1844 }
 0x4f4   :  { %v1930_v6 = vrot.slane %v1845_v33, 4 }
 0x4fa   :  { %v1855_v8 = vpop.permute.xlu1 %1854  ;;  %v1849_v9 = vpop.permute.xlu0 %1848 }
 0x4fb   :  { %v1872_v10 = vrot.slane %v1855_v8, 4  ;;  %v1875_v24 = vsel %vm338_vm1, %v1855_v8, %v1874_v20  ;;  %v1860_v22 = vrot.slane %v1849_v9, 4  ;;  %v1863_v27 = vsel %vm338_vm1, %v1849_v9, %v1862_v59 }
 0x4fc   :  { %v1883_v25 = vperm.slane %v1875_v24, %v3923_v43  ;;  %v1871_v16 = vperm.slane %v1863_v27, %v3923_v43 }
 0x4fd   :  { %v1873_v56 = vsel %vm338_vm1, %v1872_v10, %v1843_v19  ;;  %v1861_v38 = vsel %vm338_vm1, %v1860_v22, %v1838_v3 }
 0x4fe   :  { %v1879_v18 = vperm.slane %v1873_v56, %v3923_v43  ;;  %v1896_v23 = vrot.slane %v1883_v25, 4  ;;  %v1867_v14 = vperm.slane %v1861_v38, %v3923_v43  ;;  %v1898_v28 = vrot.slane %v1871_v16, 4 }
 0x500   :  { %v1884_v29 = vrot.slane %v1879_v18, 4  ;;  %v1886_v31 = vrot.slane %v1867_v14, 4  ;;  %v1897_v13 = vsel %vm338_vm1, %v1896_v23, %v1871_v16  ;;  %v1899_v32 = vsel %vm338_vm1, %v1883_v25, %v1898_v28 }
 0x501   :  { %v1903_v35 = vperm.slane %v1897_v13, %v3933_v55  ;;  %v1907_v36 = vperm.slane %v1899_v32, %v3933_v55 }
 0x502   :  { %v1885_v51 = vsel %vm338_vm1, %v1884_v29, %v1867_v14  ;;  %v1887_v0 = vsel %vm338_vm1, %v1879_v18, %v1886_v31  ;;  %v2097_v39 = vpop.permute.xlu1 %2096  ;;  %v2091_v26 = vpop.permute.xlu0 %2090 }
 0x503   :  { %v1891_v44 = vperm.slane %v1885_v51, %v3933_v55  ;;  %v1895_v45 = vperm.slane %v1887_v0, %v3933_v55  ;;  %v1912_v34 = vrot.slane %v1903_v35, 4  ;;  %v1914_v61 = vrot.slane %v1907_v36, 4 }
 0x504   :  { %v2168_v5 = vrot.slane %v2097_v39, 4  ;;  %v2171_v46 = vsel %vm338_vm1, %v2097_v39, %v2170_v41  ;;  %v2156_v42 = vrot.slane %v2091_v26, 4  ;;  %v2159_v53 = vsel %vm338_vm1, %v2091_v26, %v2158_v15 }
 0x505   :  { %v1908_v47 = vrot.slane %v1891_v44, 4  ;;  %v1910_v50 = vrot.slane %v1895_v45, 4  ;;  %v1915_v52 = vsel %vm338_vm1, 0.0, %v1914_v61  ;;  %v1983_v54 = vsel %vm338_vm1, %v1914_v61, %v1903_v35 }
 0x506   :  { %v1988_v57 = vrot.slane %v1915_v52, 4  ;;  %v2169_v58 = vsel %vm338_vm1, %v2168_v5, %v2085_v37  ;;  %v2179_v48 = vperm.slane %v2171_v46, %v3923_v43  ;;  %v1913_v60 = vsel %vm338_vm1, 0.0, %v1912_v34 }
 0x507   :  { %v1911_v49 = vsel %vm338_vm1, 0.0, %v1910_v50  ;;  %v1972_v11 = vsel %vm338_vm1, %v1910_v50, %v1891_v44  ;;  %v4535_v62 = vperm.slane %v1983_v54, %v3923_v43  ;;  %v2175_v1 = vperm.slane %v2169_v58, %v3923_v43 }
 0x508   :  { %v1977_v21 = vrot.slane %v1911_v49, 4  ;;  %v1989_v63 = vsel %vm338_vm1, %v1988_v57, %v1913_v60  ;;  %v2192_v3 = vrot.slane %v2179_v48, 4  ;;  %v1909_v4 = vsel %vm338_vm1, 0.0, %v1908_v47 }
 0x509   :  { %v4541_v2 = vperm.slane %v1989_v63, %v3923_v43  ;;  %v2157_v19 = vsel %vm338_vm1, %v2156_v42, %v4188_v30  ;;  %v2167_v37 = vperm.slane %v2159_v53, %v3923_v43  ;;  %v2008_v20 = vrot.slane %v4535_v62, 4 }
 0x50a   :  { %v2180_v59 = vrot.slane %v2175_v1, 4  ;;  %v2163_v8 = vperm.slane %v2157_v19, %v3923_v43  ;;  %v1857_v9 = vpop.permute.xlu1 %1856  ;;  %v4549_v10 = vperm.slane %v1972_v11, %v3923_v43  ;;  %v1978_v25 = vsel %vm338_vm1, %v1977_v21, %v1909_v4  ;;  %v1851_v18 = vpop.permute.xlu0 %1850 }
 0x50b   :  { %v2193_v24 = vsel %vm338_vm1, %v2192_v3, %v2167_v37  ;;  %v2194_v22 = vrot.slane %v2167_v37, 4  ;;  %v1928_v27 = vrot.slane %v1857_v9, 4  ;;  %v1931_v38 = vsel %vm338_vm1, %v1857_v9, %v1930_v6 }
 0x50c   :  { %v2181_v16 = vsel %vm338_vm1, %v2180_v59, %v2163_v8  ;;  %v2182_v30 = vrot.slane %v2163_v8, 4  ;;  %v2199_v56 = vperm.slane %v2193_v24, %v3933_v55  ;;  %v1939_v29 = vperm.slane %v1931_v38, %v3923_v43 }
 0x50d   :  { %v2187_v23 = vperm.slane %v2181_v16, %v3933_v55  ;;  %v2195_v14 = vsel %vm338_vm1, %v2179_v48, %v2194_v22  ;;  %v1929_v28 = vsel %vm338_vm1, %v1928_v27, %v1845_v33  ;;  %v2006_v36 = vrot.slane %v4541_v2, 4 }
 0x50e   :  { %v2183_v31 = vsel %vm338_vm1, %v2175_v1, %v2182_v30  ;;  %v2203_v13 = vperm.slane %v2195_v14, %v3933_v55  ;;  %v2208_v32 = vrot.slane %v2199_v56, 4  ;;  %v1935_v35 = vperm.slane %v1929_v28, %v3923_v43 }
 0x50f   :  { %v2191_v15 = vperm.slane %v2183_v31, %v3933_v55  ;;  %v2204_v41 = vrot.slane %v2187_v23, 4  ;;  %v1916_v51 = vrot.slane %v1851_v18, 4  ;;  %v1952_v26 = vrot.slane %v1939_v29, 4 }
 0x510   :  { %v2210_v0 = vrot.slane %v2203_v13, 4  ;;  %v1940_v39 = vrot.slane %v1935_v35, 4  ;;  %v1919_v33 = vsel %vm338_vm1, %v1851_v18, %v1918_v40  ;;  %v2209_v45 = vsel %vm338_vm1, 0.0, %v2208_v32 }
 0x511   :  { %v2206_v44 = vrot.slane %v2191_v15, 4  ;;  %v1917_v34 = vsel %vm338_vm1, %v1916_v51, %v4499_v7  ;;  %v1927_v61 = vperm.slane %v1919_v33, %v3923_v43  ;;  %v2205_v6 = vsel %vm338_vm1, 0.0, %v2204_v41 }
 0x512   :  { %v2211_v5 = vsel %vm338_vm1, 0.0, %v2210_v0  ;;  %v2277_v46 = vsel %vm338_vm1, %v2210_v0, %v2199_v56  ;;  %v1923_v42 = vperm.slane %v1917_v34, %v3923_v43  ;;  %v1982_v52 = vperm.slane %v1978_v25, %v3923_v43 }
 0x513   :  { %v2207_v47 = vsel %vm338_vm1, 0.0, %v2206_v44  ;;  %v2266_v40 = vsel %vm338_vm1, %v2206_v44, %v2187_v23  ;;  %v2282_v50 = vrot.slane %v2211_v5, 4  ;;  %v2281_v53 = vperm.slane %v2277_v46, %v3923_v43 }
 0x514   :  { %v1941_v7 = vsel %vm338_vm1, %v1940_v39, %v1923_v42  ;;  %v1942_v54 = vrot.slane %v1923_v42, 4  ;;  %v1953_v57 = vsel %vm338_vm1, %v1952_v26, %v1927_v61  ;;  %v2271_v58 = vrot.slane %v2207_v47, 4 }
 0x515   :  { %v2283_v48 = vsel %vm338_vm1, %v2282_v50, %v2209_v45  ;;  %v1947_v49 = vperm.slane %v1941_v7, %v3933_v55  ;;  %v1954_v60 = vrot.slane %v1927_v61, 4  ;;  %v1959_v63 = vperm.slane %v1953_v57, %v3933_v55 }
 0x516   :  { %v2287_v11 = vperm.slane %v2283_v48, %v3923_v43  ;;  %v1943_v21 = vsel %vm338_vm1, %v1935_v35, %v1942_v54  ;;  %v1996_v1 = vrot.slane %v4549_v10, 4  ;;  %v2009_v37 = vsel %vm338_vm1, %v4541_v2, %v2008_v20 }
 0x517   :  { %v1951_v3 = vperm.slane %v1943_v21, %v3933_v55  ;;  %v1955_v4 = vsel %vm338_vm1, %v1939_v29, %v1954_v60  ;;  %v1964_v19 = vrot.slane %v1947_v49, 4  ;;  %v2302_v59 = vrot.slane %v2281_v53, 4 }
 0x518   :  { %v1963_v8 = vperm.slane %v1955_v4, %v3933_v55  ;;  %v1968_v9 = vrot.slane %v1959_v63, 4  ;;  %v1997_v24 = vsel %vm338_vm1, %v1982_v52, %v1996_v1  ;;  %v2300_v22 = vrot.slane %v2287_v11, 4 }
 0x519   :  { %v1966_v27 = vrot.slane %v1951_v3, 4  ;;  %v2005_v25 = vperm.slane %v1997_v24, %v3933_v55  ;;  %v2017_v16 = vperm.slane %v2009_v37, %v3933_v55  ;;  %v1965_v30 = vsel %vm338_vm1, 0.0, %v1964_v19 }
 0x51a   :  { %v1970_v56 = vrot.slane %v1963_v8, 4  ;;  %v1994_v38 = vrot.slane %v1982_v52, 4  ;;  %v2007_v18 = vsel %vm338_vm1, %v2006_v36, %v4535_v62  ;;  %v1969_v2 = vsel %vm338_vm1, 0.0, %v1968_v9 }
 0x51b   :  { %v2022_v20 = vrot.slane %v2017_v16, 4  ;;  %v2013_v23 = vperm.slane %v2007_v18, %v3933_v55  ;;  %v2270_v14 = vperm.slane %v2266_v40, %v3923_v43  ;;  %v1967_v28 = vsel %vm338_vm1, 0.0, %v1966_v27 }
 0x51c   :  { %v1971_v29 = vsel %vm338_vm1, 0.0, %v1970_v56  ;;  %v2037_v31 = vsel %vm338_vm1, %v1970_v56, %v1959_v63  ;;  %v1995_v13 = vsel %vm338_vm1, %v1994_v38, %v4549_v10  ;;  %v2272_v41 = vsel %vm338_vm1, %v2271_v58, %v2205_v6 }
 0x51d   :  { %v2041_v32 = vperm.slane %v2037_v31, %v3923_v43  ;;  %v2042_v35 = vrot.slane %v1971_v29, 4  ;;  %v2023_v62 = vsel %vm338_vm1, %v2022_v20, %v2005_v25  ;;  %v2001_v36 = vperm.slane %v1995_v13, %v3933_v55  ;;  %v3558_v31 = vld [vmem:[#allocation7] sm:$0xff] }
 0x51e   :  { %3420 = vmatmul.msk.f32.vlgmr.msrb.gmra.mxu1 %vm167_vm0, %v2023_v62  ;;  %v2018_v15 = vrot.slane %v2013_v23, 4  ;;  %v2290_v51 = vrot.slane %v2270_v14, 4  ;;  %v2303_v0 = vsel %vm338_vm1, %v2287_v11, %v2302_v59  ;;  %v2031_v39 = vrot.slane %v1967_v28, 4 }
 0x51f   :  { %v2043_v26 = vsel %vm338_vm1, %v2042_v35, %v1969_v2  ;;  %v2020_v33 = vrot.slane %v2001_v36, 4  ;;  %v2276_v10 = vperm.slane %v2272_v41, %v3923_v43  ;;  %v2062_v45 = vrot.slane %v2041_v32, 4 }
 0x520   :  { %v2047_v44 = vperm.slane %v2043_v26, %v3923_v43  ;;  %v2019_v34 = vsel %vm338_vm1, %v2018_v15, %v2001_v36  ;;  %v2311_v61 = vperm.slane %v2303_v0, %v3933_v55  ;;  %v2301_v42 = vsel %vm338_vm1, %v2300_v22, %v2281_v53 }
 0x521   :  { %3416 = vmatmul.msk.f32.vlgmr.msrb.gmra.mxu3 %vm167_vm0, %v2019_v34  ;;  %v2021_v6 = vsel %vm338_vm1, %v2013_v23, %v2020_v33  ;;  %v2291_v5 = vsel %vm338_vm1, %v2276_v10, %v2290_v51  ;;  %v2288_v46 = vrot.slane %v2276_v10, 4  ;;  %v2024_v52 = vrot.slane %v2005_v25, 4 }
 0x522   :  { %v2060_v47 = vrot.slane %v2047_v44, 4  ;;  %3418 = vmatmul.msk.f32.vlgmr.msra.gmra.mxu0 %vm167_vm0, %v2021_v6  ;;  %v2299_v40 = vperm.slane %v2291_v5, %v3933_v55  ;;  %v2316_v50 = vrot.slane %v2311_v61, 4  ;;  %v2307_v54 = vperm.slane %v2301_v42, %v3933_v55 }
 0x523   :  { %v2289_v7 = vsel %vm338_vm1, %v2288_v46, %v2270_v14  ;;  %v2026_v57 = vsel %vm338_vm1, %v1966_v27, %v1947_v49  ;;  %v2032_v58 = vsel %vm338_vm1, %v2031_v39, %v1965_v30  ;;  %v2063_v3 = vsel %vm338_vm1, %v2047_v44, %v2062_v45 }
 0x524   :  { %v2317_v48 = vsel %vm338_vm1, %v2316_v50, %v2299_v40  ;;  %v2295_v60 = vperm.slane %v2289_v7, %v3933_v55  ;;  %v2318_v53 = vrot.slane %v2299_v40, 4  ;;  %v2030_v11 = vperm.slane %v2026_v57, %v3923_v43 }
 0x525   :  { %3427 = vmatpush.xpose.msk.msrb.mxu3 %vm167_vm0, %v2317_v48  ;;  %v2312_v21 = vrot.slane %v2307_v54, 4  ;;  %v2036_v63 = vperm.slane %v2032_v58, %v3923_v43  ;;  %v2061_v1 = vsel %vm338_vm1, %v2060_v47, %v2041_v32  ;;  %v2025_v9 = vsel %vm338_vm1, %v2017_v16, %v2024_v52 }
 0x526   :  { %v2319_v49 = vsel %vm338_vm1, %v2311_v61, %v2318_v53  ;;  %v2314_v4 = vrot.slane %v2295_v60, 4  ;;  %v2067_v19 = vperm.slane %v2061_v1, %v3933_v55  ;;  %v2050_v37 = vrot.slane %v2030_v11, 4 }
 0x527   :  { %v2313_v59 = vsel %vm338_vm1, %v2312_v21, %v2295_v60  ;;  %v2048_v8 = vrot.slane %v2036_v63, 4  ;;  %v2071_v27 = vperm.slane %v2063_v3, %v3933_v55  ;;  %v3487_v50 = vpack.i.bf16 %v4192_v17, %v4190_v12 }
 0x528   :  { %3423 = vmatpush.xpose.msk.msrb.mxu0 %vm167_vm0, %v2313_v59  ;;  %v2315_v24 = vsel %vm338_vm1, %v2307_v54, %v2314_v4  ;;  %v2072_v22 = vrot.slane %v2067_v19, 4  ;;  %v2051_v30 = vsel %vm338_vm1, %v2036_v63, %v2050_v37 }
 0x529   :  { %3422 = vmatmul.msk.f32.vlgmr.msra.gmra.mxu3 %vm167_vm0, %v2025_v9  ;;  %v2049_v25 = vsel %vm338_vm1, %v2048_v8, %v2030_v11  ;;  %3425 = vmatpush.xpose.msk.msra.mxu1 %vm167_vm0, %v2315_v24  ;;  %v2059_v38 = vperm.slane %v2051_v30, %v3933_v55  ;;  %v2076_v18 = vrot.slane %v2071_v27, 4 }
 0x52a   :  { %v2055_v56 = vperm.slane %v2049_v25, %v3933_v55 }
 0x52b   :  { %v2077_v23 = vsel %vm338_vm1, %v2076_v18, %v2059_v38  ;;  %v2078_v14 = vrot.slane %v2059_v38, 4 }
 0x52c   :  { %3429 = vmatpush.xpose.msk.msra.mxu0 %vm167_vm0, %v2319_v49  ;;  %v2073_v16 = vsel %vm338_vm1, %v2072_v22, %v2055_v56  ;;  %v2074_v2 = vrot.slane %v2055_v56, 4 }
 0x52d   :  { %3424 = vmatmul.msk.f32.vlgmr.msrb.gmra.mxu0 %vm167_vm0, %v2073_v16  ;;  %v2079_v28 = vsel %vm338_vm1, %v2071_v27, %v2078_v14 }
 0x52e   :  { %v2075_v20 = vsel %vm338_vm1, %v2067_v19, %v2074_v2 }
 0x52f   :  { %3426 = vmatmul.msk.f32.vlgmr.msra.gmra.mxu1 %vm167_vm0, %v2075_v20 }
 0x531   :  { %3428 = vmatmul.msk.f32.vlgmr.msrb.gmra.mxu3 %vm167_vm0, %v2077_v23 }
 0x535   :  { %3430 = vmatmul.msk.f32.vlgmr.msra.gmra.mxu0 %vm167_vm0, %v2079_v28 }
 0x59b   :  { %v2635_v29 = vpop.f32.mrf.mxu1 }
 0x59c   :  { %v2636_v13 = vadd.f32 %v3558_v31, %v2635_v29 }
 0x59e   :  { %v2774_v32 = vsel %vm1246_vm2, %v2636_v13, -inf }
 0x59f   :  { %v2609_v35 = vpop.f32.mrf.mxu0  ;;  %2775 = vmax.xlane.f32.xlu1 %v2774_v32 }
 0x5a0   :  { %v2610_v62 = vadd.f32 %v3558_v31, %v2609_v35 }
 0x5a2   :  { %v2771_v36 = vsel %vm1246_vm2, %v2610_v62, -inf }
 0x5a3   :  { %2772 = vmax.xlane.f32.xlu0 %v2771_v36 }
 0x5a4   :  { %v2583_v15 = vpop.f32.mrf.mxu3 }
 0x5a5   :  { %v2584_v41 = vadd.f32 %v3558_v31, %v2583_v15 }
 0x5a7   :  { %v2768_v51 = vsel %vm1246_vm2, %v2584_v41, -inf }
 0x5a8   :  { %2769 = vmax.xlane.f32.xlu2 %v2768_v51 }
 0x5aa   :  { %v2687_v0 = vpop.f32.mrf.mxu0 }
 0x5ab   :  { %v2688_v39 = vadd.f32 %v3558_v31, %v2687_v0 }
 0x5ac   :  { %v2661_v26 = vpop.f32.mrf.mxu3  ;;  %v2713_v44 = vpop.f32.mrf.mxu1 }
 0x5ad   :  { %v2662_v33 = vadd.f32 %v3558_v31, %v2661_v26  ;;  %v2780_v10 = vsel %vm1246_vm2, %v2688_v39, -inf  ;;  %v2714_v34 = vadd.f32 %v3558_v31, %v2713_v44 }
 0x5ae   :  { %2781 = vmax.xlane.f32.xlu0 %v2780_v10 }
 0x5af   :  { %v2777_v45 = vsel %vm1246_vm2, %v2662_v33, -inf  ;;  %v2783_v47 = vsel %vm1246_vm2, %v2714_v34, -inf }
 0x5b0   :  { %2778 = vmax.xlane.f32.xlu2 %v2777_v45 }
 0x5b2   :  { %v2765_v61 = vpop.f32.mrf.mxu0 }
 0x5b3   :  { %v2766_v6 = vadd.f32 %v3558_v31, %v2765_v61 }
 0x5b4   :  { %v2739_v5 = vpop.f32.mrf.mxu3 }
 0x5b5   :  { %v2740_v46 = vadd.f32 %v3558_v31, %v2739_v5  ;;  %v2789_v42 = vsel %vm1246_vm2, %v2766_v6, -inf }
 0x5b6   :  { %2790 = vmax.xlane.f32.xlu1 %v2789_v42  ;;  %2784 = vmax.xlane.f32.xlu0 %v2783_v47 }
 0x5b7   :  { %v2786_v40 = vsel %vm1246_vm2, %v2740_v46, -inf }
 0x5b8   :  { %2787 = vmax.xlane.f32.xlu2 %v2786_v40 }
 0x5ca   :  { %3488 = vrot.lane.b32.xlu0 %v3487_v50, %s3774_s15 }
 0x5cf   :  { %3478 = vrot.lane.b32.xlu1 %v3487_v50, %s3776_s4 }
 0x5d0   :  { %3483 = vrot.lane.b32.xlu2 %v3487_v50, %s3775_s16 }
 0x612   :  { %v2776_v52 = vpop.xlane.xlu1 %2775 }
 0x613   :  { %v2794_v7 = vsub.f32 %v2636_v13, %v2776_v52 }
 0x615   :  { %v2804_v54 = vmul.f32 1.442695, %v2794_v7 }
 0x616   :  { %v2773_v57 = vpop.xlane.xlu0 %2772 }
 0x617   :  { %3526 = vpow2.f32 %v2804_v54  ;;  %v2793_v58 = vsub.f32 %v2610_v62, %v2773_v57 }
 0x619   :  { %v2802_v48 = vmul.f32 1.442695, %v2793_v58 }
 0x61b   :  { %3528 = vpow2.f32 %v2802_v48  ;;  %v2770_v60 = vpop.xlane.xlu2 %2769 }
 0x61c   :  { %v2792_v53 = vsub.f32 %v2584_v41, %v2770_v60 }
 0x61d   :  { %v4668_v11 = vpop.eup %3526 }
 0x61e   :  { %v2800_v21 = vmul.f32 1.442695, %v2792_v53  ;;  %v2822_v63 = vsel %vm1246_vm2, %v4668_v11, 0.0 }
 0x61f   :  { %2823 = vadd.xlane.f32.xlu2 %v2822_v63 }
 0x620   :  { %3530 = vpow2.f32 %v2800_v21 }
 0x621   :  { %v4672_v1 = vpop.eup %3528  ;;  %v2782_v3 = vpop.xlane.xlu0 %2781 }
 0x622   :  { %v2819_v49 = vsel %vm1246_vm2, %v4672_v1, 0.0  ;;  %v2796_v4 = vsub.f32 %v2688_v39, %v2782_v3  ;;  %v2342_v39 = vrot.slane %v4190_v12, 4 }
 0x623   :  { %v2779_v19 = vpop.xlane.xlu2 %2778  ;;  %2820 = vadd.xlane.f32.xlu0 %v2819_v49 }
 0x624   :  { %v2795_v37 = vsub.f32 %v2662_v33, %v2779_v19  ;;  %v2808_v59 = vmul.f32 1.442695, %v2796_v4  ;;  %v2398_v33 = vrot.slane %v4192_v17, 4 }
 0x626   :  { %v4676_v8 = vpop.eup %3530  ;;  %v2806_v9 = vmul.f32 1.442695, %v2795_v37  ;;  %3532 = vpow2.f32 %v2808_v59 }
 0x627   :  { %v2816_v24 = vsel %vm1246_vm2, %v4676_v8, 0.0 }
 0x628   :  { %3534 = vpow2.f32 %v2806_v9  ;;  %2817 = vadd.xlane.f32.xlu1 %v2816_v24 }
 0x629   :  { %v2791_v22 = vpop.xlane.xlu1 %2790  ;;  %v2785_v27 = vpop.xlane.xlu0 %2784 }
 0x62a   :  { %v2799_v25 = vsub.f32 %v2766_v6, %v2791_v22  ;;  %v2797_v30 = vsub.f32 %v2714_v34, %v2785_v27 }
 0x62b   :  { %v2788_v56 = vpop.xlane.xlu2 %2787 }
 0x62c   :  { %v4680_v16 = vpop.eup %3532  ;;  %v2798_v38 = vsub.f32 %v2740_v46, %v2788_v56  ;;  %v2814_v18 = vmul.f32 1.442695, %v2799_v25  ;;  %v2810_v2 = vmul.f32 1.442695, %v2797_v30 }
 0x62d   :  { %v2828_v20 = vsel %vm1246_vm2, %v4680_v16, 0.0 }
 0x62e   :  { %v4684_v23 = vpop.eup %3534  ;;  %v2812_v14 = vmul.f32 1.442695, %v2798_v38  ;;  %3536 = vpow2.f32 %v2814_v18  ;;  %2829 = vadd.xlane.f32.xlu0 %v2828_v20 }
 0x62f   :  { %3538 = vpow2.f32 %v2810_v2  ;;  %v2825_v28 = vsel %vm1246_vm2, %v4684_v23, 0.0 }
 0x630   :  { %3540 = vpow2.f32 %v2812_v14  ;;  %2826 = vadd.xlane.f32.xlu1 %v2825_v28 }
 0x633   :  { %v3484_v29 = vpop.permute.xlu2 %3483 }
 0x634   :  { %v4688_v31 = vpop.eup %3536  ;;  %v3486_v62 = vunpack.i.h.bf16 %v3484_v29  ;;  %v3485_v36 = vunpack.i.l.bf16 %v3484_v29 }
 0x635   :  { %v4690_v13 = vpop.eup %3538  ;;  %v2837_v32 = vsel %vm1246_vm2, %v4688_v31, 0.0 }
 0x636   :  { %v4694_v35 = vpop.eup %3540  ;;  %2838 = vadd.xlane.f32.xlu2 %v2837_v32  ;;  %v2831_v41 = vsel %vm1246_vm2, %v4690_v13, 0.0  ;;  %v2396_v51 = vrot.slane %v3486_v62, 4  ;;  %v2340_v0 = vrot.slane %v3485_v36, 4  ;;  %v2343_v10 = vsel %vm338_vm1, %v3485_v36, %v2342_v39 }
 0x637   :  { %v2834_v15 = vsel %vm1246_vm2, %v4694_v35, 0.0  ;;  %2832 = vadd.xlane.f32.xlu0 %v2831_v41  ;;  %v2399_v6 = vsel %vm338_vm1, %v3486_v62, %v2398_v33  ;;  %v2351_v42 = vperm.slane %v2343_v10, %v3923_v43 }
 0x638   :  { %2835 = vadd.xlane.f32.xlu1 %v2834_v15  ;;  %v2397_v44 = vsel %vm338_vm1, %v2396_v51, %v4192_v17  ;;  %v2341_v45 = vsel %vm338_vm1, %v2340_v0, %v4190_v12  ;;  %v2407_v17 = vperm.slane %v2399_v6, %v3923_v43 }
 0x639   :  { %v2403_v5 = vperm.slane %v2397_v44, %v3923_v43  ;;  %v2347_v46 = vperm.slane %v2341_v45, %v3923_v43  ;;  %v2378_v63 = vrot.slane %v2351_v42, 4 }
 0x63a   :  { %v2434_v9 = vrot.slane %v2407_v17, 4 }
 0x63b   :  { %v2366_v48 = vrot.slane %v2347_v46, 4  ;;  %v2422_v21 = vrot.slane %v2403_v5, 4 }
 0x63c   :  { %v3489_v26 = vpop.permute.xlu0 %3488 }
 0x63d   :  { %v3491_v34 = vunpack.i.h.bf16 %v3489_v26  ;;  %v3490_v61 = vunpack.i.l.bf16 %v3489_v26 }
 0x63f   :  { %v2408_v40 = vrot.slane %v3491_v34, 4  ;;  %v2352_v50 = vrot.slane %v3490_v61, 4 }
 0x641   :  { %v3479_v47 = vpop.permute.xlu1 %3478 }
 0x642   :  { %v3481_v52 = vunpack.i.h.bf16 %v3479_v47  ;;  %v3480_v7 = vunpack.i.l.bf16 %v3479_v47 }
 0x644   :  { %v2410_v54 = vrot.slane %v3481_v52, 4  ;;  %v2353_v12 = vsel %vm338_vm1, %v2352_v50, %v3480_v7  ;;  %v2354_v57 = vrot.slane %v3480_v7, 4  ;;  %v2409_v58 = vsel %vm338_vm1, %v2408_v40, %v3481_v52 }
 0x645   :  { %v2359_v60 = vperm.slane %v2353_v12, %v3923_v43  ;;  %v2415_v53 = vperm.slane %v2409_v58, %v3923_v43 }
 0x646   :  { %v2355_v3 = vsel %vm338_vm1, %v3490_v61, %v2354_v57  ;;  %v2411_v49 = vsel %vm338_vm1, %v3491_v34, %v2410_v54 }
 0x647   :  { %v2363_v4 = vperm.slane %v2355_v3, %v3923_v43  ;;  %v2364_v19 = vrot.slane %v2359_v60, 4  ;;  %v2367_v37 = vsel %vm338_vm1, %v2359_v60, %v2366_v48  ;;  %v2419_v59 = vperm.slane %v2411_v49, %v3923_v43 }
 0x648   :  { %v2375_v24 = vperm.slane %v2367_v37, %v3933_v55  ;;  %v2420_v22 = vrot.slane %v2415_v53, 4  ;;  %v2423_v27 = vsel %vm338_vm1, %v2415_v53, %v2422_v21 }
 0x649   :  { %v2365_v25 = vsel %vm338_vm1, %v2364_v19, %v2347_v46  ;;  %v2376_v30 = vrot.slane %v2363_v4, 4  ;;  %v2379_v56 = vsel %vm338_vm1, %v2363_v4, %v2378_v63  ;;  %v2431_v38 = vperm.slane %v2423_v27, %v3933_v55 }
 0x64a   :  { %v2371_v18 = vperm.slane %v2365_v25, %v3933_v55  ;;  %v2387_v2 = vperm.slane %v2379_v56, %v3933_v55  ;;  %v2390_v20 = vrot.slane %v2375_v24, 4  ;;  %v2421_v14 = vsel %vm338_vm1, %v2420_v22, %v2403_v5 }
 0x64b   :  { %v2377_v28 = vsel %vm338_vm1, %v2376_v30, %v2351_v42  ;;  %v2427_v29 = vperm.slane %v2421_v14, %v3933_v55  ;;  %v2432_v32 = vrot.slane %v2419_v59, 4  ;;  %v2435_v62 = vsel %vm338_vm1, %v2419_v59, %v2434_v9 }
 0x64c   :  { %v2383_v36 = vperm.slane %v2377_v28, %v3933_v55  ;;  %v2388_v15 = vrot.slane %v2371_v18, 4  ;;  %v2391_v41 = vsel %vm338_vm1, 0.0, %v2390_v20  ;;  %v2394_v51 = vrot.slane %v2387_v2, 4 }
 0x64d   :  { %v2433_v0 = vsel %vm338_vm1, %v2432_v32, %v2407_v17  ;;  %v2443_v39 = vperm.slane %v2435_v62, %v3933_v55  ;;  %v2444_v26 = vrot.slane %v2427_v29, 4  ;;  %v2446_v33 = vrot.slane %v2431_v38, 4 }
 0x64e   :  { %v2389_v10 = vsel %vm338_vm1, 0.0, %v2388_v15  ;;  %v2392_v44 = vrot.slane %v2383_v36, 4  ;;  %v2395_v45 = vsel %vm338_vm1, 0.0, %v2394_v51  ;;  %v2439_v34 = vperm.slane %v2433_v0, %v3933_v55 }
 0x64f   :  { %v2447_v61 = vsel %vm338_vm1, 0.0, %v2446_v33  ;;  %v2450_v6 = vrot.slane %v2443_v39, 4  ;;  %v2457_v5 = vrot.slane %v2391_v41, 4  ;;  %v2468_v46 = vrot.slane %v2395_v45, 4 }
 0x650   :  { %v2506_v42 = vsel %vm338_vm1, %v2446_v33, %v2427_v29  ;;  %v2511_v47 = vrot.slane %v2447_v61, 4  ;;  %v2445_v40 = vsel %vm338_vm1, 0.0, %v2444_v26  ;;  %v2448_v50 = vrot.slane %v2439_v34, 4 }
 0x651   :  { %v2451_v52 = vsel %vm338_vm1, 0.0, %v2450_v6  ;;  %v2510_v7 = vperm.slane %v2506_v42, %v3923_v43  ;;  %v2517_v17 = vsel %vm338_vm1, %v2450_v6, %v2439_v34  ;;  %v2393_v54 = vsel %vm338_vm1, 0.0, %v2392_v44 }
 0x652   :  { %v2522_v12 = vrot.slane %v2451_v52, 4  ;;  %v2449_v57 = vsel %vm338_vm1, 0.0, %v2448_v50  ;;  %v2512_v58 = vsel %vm338_vm1, %v2511_v47, %v2445_v40  ;;  %v2521_v48 = vperm.slane %v2517_v17, %v3923_v43 }
 0x653   :  { %v2516_v60 = vperm.slane %v2512_v58, %v3923_v43  ;;  %v2530_v53 = vrot.slane %v2510_v7, 4  ;;  %v2452_v21 = vsel %vm338_vm1, %v2390_v20, %v2371_v18  ;;  %v2458_v63 = vsel %vm338_vm1, %v2457_v5, %v2389_v10 }
 0x654   :  { %v2523_v3 = vsel %vm338_vm1, %v2522_v12, %v2449_v57  ;;  %v2542_v49 = vrot.slane %v2521_v48, 4  ;;  %v2456_v4 = vperm.slane %v2452_v21, %v3923_v43  ;;  %v2462_v19 = vperm.slane %v2458_v63, %v3923_v43 }
 0x655   :  { %v2527_v37 = vperm.slane %v2523_v3, %v3923_v43  ;;  %v2531_v59 = vsel %vm338_vm1, %v2516_v60, %v2530_v53  ;;  %v2463_v9 = vsel %vm338_vm1, %v2394_v51, %v2383_v36  ;;  %v2469_v24 = vsel %vm338_vm1, %v2468_v46, %v2393_v54 }
 0x656   :  { %v2539_v22 = vperm.slane %v2531_v59, %v3933_v55  ;;  %v2467_v27 = vperm.slane %v2463_v9, %v3923_v43  ;;  %v2473_v25 = vperm.slane %v2469_v24, %v3923_v43  ;;  %v2474_v30 = vrot.slane %v2462_v19, 4 }
 0x657   :  { %v2543_v56 = vsel %vm338_vm1, %v2527_v37, %v2542_v49  ;;  %v2476_v38 = vrot.slane %v2456_v4, 4  ;;  %v2528_v18 = vrot.slane %v2516_v60, 4  ;;  %v2540_v2 = vrot.slane %v2527_v37, 4 }
 0x658   :  { %v2551_v20 = vperm.slane %v2543_v56, %v3933_v55  ;;  %v2558_v14 = vrot.slane %v2539_v22, 4  ;;  %v2475_v28 = vsel %vm338_vm1, %v2474_v30, %v2456_v4  ;;  %v2486_v29 = vrot.slane %v2473_v25, 4 }
 0x659   :  { %v2481_v32 = vperm.slane %v2475_v28, %v3933_v55  ;;  %v2477_v62 = vsel %vm338_vm1, %v2462_v19, %v2476_v38  ;;  %v2488_v36 = vrot.slane %v2467_v27, 4  ;;  %v2529_v15 = vsel %vm338_vm1, %v2528_v18, %v2510_v7 }
 0x65a   :  { %v2559_v41 = vsel %vm338_vm1, %v2551_v20, %v2558_v14  ;;  %v2487_v51 = vsel %vm338_vm1, %v2486_v29, %v2467_v27  ;;  %v2485_v0 = vperm.slane %v2477_v62, %v3933_v55  ;;  %v2535_v39 = vperm.slane %v2529_v15, %v3933_v55 }
 0x65b   :  { %3059 = vmatpush.msrb.mxu2 %v2559_v41  ;;  %v2493_v26 = vperm.slane %v2487_v51, %v3933_v55  ;;  %v2500_v33 = vrot.slane %v2481_v32, 4  ;;  %v2489_v10 = vsel %vm338_vm1, %v2473_v25, %v2488_v36  ;;  %v2541_v44 = vsel %vm338_vm1, %v2540_v2, %v2521_v48 }
 0x65c   :  { %v2497_v45 = vperm.slane %v2489_v10, %v3933_v55  ;;  %v2547_v34 = vperm.slane %v2541_v44, %v3933_v55  ;;  %v2554_v61 = vrot.slane %v2535_v39, 4  ;;  %v2504_v46 = vrot.slane %v2485_v0, 4 }
 0x65d   :  { %v2501_v6 = vsel %vm338_vm1, %v2493_v26, %v2500_v33  ;;  %v2498_v5 = vrot.slane %v2493_v26, 4  ;;  %v2556_v42 = vrot.slane %v2551_v20, 4 }
 0x65e   :  { %2921 = vmatpush.msra.mxu3 %v2501_v6  ;;  %v2502_v47 = vrot.slane %v2497_v45, 4  ;;  %v2552_v40 = vrot.slane %v2547_v34, 4  ;;  %v2555_v50 = vsel %vm338_vm1, %v2547_v34, %v2554_v61  ;;  %v2505_v12 = vsel %vm338_vm1, %v2497_v45, %v2504_v46 }
 0x65f   :  { %v2499_v52 = vsel %vm338_vm1, %v2498_v5, %v2481_v32  ;;  %v2557_v7 = vsel %vm338_vm1, %v2556_v42, %v2539_v22 }
 0x660   :  { %v2503_v17 = vsel %vm338_vm1, %v2502_v47, %v2485_v0  ;;  %2898 = vmatpush.msrb.mxu1 %v2499_v52  ;;  %v2553_v54 = vsel %vm338_vm1, %v2552_v40, %v2535_v39 }
 0x661   :  { %2944 = vmatpush.msrb.mxu0 %v2503_v17  ;;  %2990 = vmatpush.msrb.mxu3 %v2553_v54 }
 0x662   :  { %2967 = vmatpush.msra.mxu1 %v2505_v12 }
 0x663   :  { %3013 = vmatpush.msra.mxu0 %v2555_v50 }
 0x692   :  { %v2824_v57 = vpop.xlane.xlu2 %2823 }
 0x693   :  { %3542 = vrcp.f32 %v2824_v57 }
 0x696   :  { %v2821_v58 = vpop.xlane.xlu0 %2820 }
 0x697   :  { %3544 = vrcp.f32 %v2821_v58 }
 0x699   :  { %v3543_v48 = vpop.eup %3542 }
 0x69a   :  { %v2850_v60 = vmul.f32 %v3543_v48, %v2824_v57 }
 0x69b   :  { %v2818_v53 = vpop.xlane.xlu1 %2817 }
 0x69c   :  { %v2858_v21 = vsub.f32 2.0, %v2850_v60  ;;  %3546 = vrcp.f32 %v2818_v53 }
 0x69d   :  { %v3545_v63 = vpop.eup %3544 }
 0x69e   :  { %v2866_v3 = vmul.f32 %v3543_v48, %v2858_v21  ;;  %v2849_v49 = vmul.f32 %v3545_v63, %v2821_v58 }
 0x6a0   :  { %v2874_v4 = vmul.f32 %v4668_v11, %v2866_v3  ;;  %v2857_v19 = vsub.f32 2.0, %v2849_v49 }
 0x6a1   :  { %v2830_v37 = vpop.xlane.xlu0 %2829 }
 0x6a2   :  { %v3547_v59 = vpop.eup %3546  ;;  %v2865_v9 = vmul.f32 %v3545_v63, %v2857_v19  ;;  %3433 = vmatmul.msk.f32.vlgmr.msrb.gmra.mxu0 %vm1246_vm2, %v2874_v4  ;;  %3548 = vrcp.f32 %v2830_v37 }
 0x6a3   :  { %v2848_v24 = vmul.f32 %v3547_v59, %v2818_v53  ;;  %v2827_v22 = vpop.xlane.xlu1 %2826 }
 0x6a4   :  { %v2873_v27 = vmul.f32 %v4672_v1, %v2865_v9  ;;  %3550 = vrcp.f32 %v2827_v22 }
 0x6a5   :  { %v2856_v25 = vsub.f32 2.0, %v2848_v24 }
 0x6a6   :  { %3432 = vmatmul.msk.f32.vlgmr.msra.gmra.mxu3 %vm1246_vm2, %v2873_v27  ;;  %v3328_v27 = vld [vmem:[#allocation13 + $0x70] sm:$0xff] }
 0x6a7   :  { %v2864_v30 = vmul.f32 %v3547_v59, %v2856_v25 }
 0x6a8   :  { %v3549_v56 = vpop.eup %3548 }
 0x6a9   :  { %v2872_v38 = vmul.f32 %v4676_v8, %v2864_v30  ;;  %v2852_v11 = vmul.f32 %v3549_v56, %v2830_v37  ;;  %v2839_v18 = vpop.xlane.xlu2 %2838 }
 0x6aa   :  { %v3551_v2 = vpop.eup %3550  ;;  %3552 = vrcp.f32 %v2839_v18  ;;  %v2833_v29 = vpop.xlane.xlu0 %2832 }
 0x6ab   :  { %v2851_v20 = vmul.f32 %v3551_v2, %v2827_v22  ;;  %v2860_v14 = vsub.f32 2.0, %v2852_v11  ;;  %v2836_v28 = vpop.xlane.xlu1 %2835  ;;  %3431 = vmatmul.msk.f32.vlgmr.msrb.gmra.mxu1 %vm1246_vm2, %v2872_v38  ;;  %v3329_v22 = vld [vmem:[#allocation13 + $0x78] sm:$0xff] }
 0x6ac   :  { %3554 = vrcp.f32 %v2836_v28  ;;  %3036 = vmatpush.msrb.mxu1 %v2557_v7  ;;  %3334 = vmatpush.msra.mxu3 %v3329_v22 }
 0x6ad   :  { %v2859_v1 = vsub.f32 2.0, %v2851_v20  ;;  %v2868_v32 = vmul.f32 %v3549_v56, %v2860_v14  ;;  %3556 = vrcp.f32 %v2833_v29  ;;  %v3327_v20 = vld [vmem:[#allocation13 + $0x68] sm:$0xff] }
 0x6ae   :  { %3335 = vmatpush.msra.mxu3 %v3328_v27 }
 0x6af   :  { %v2867_v62 = vmul.f32 %v3551_v2, %v2859_v1  ;;  %v2876_v36 = vmul.f32 %v4680_v16, %v2868_v32 }
 0x6b0   :  { %v3553_v15 = vpop.eup %3552  ;;  %3336 = vmatpush.msra.mxu3 %v3327_v20 }
 0x6b1   :  { %v2875_v8 = vmul.f32 %v4684_v23, %v2867_v62  ;;  %v2855_v41 = vmul.f32 %v3553_v15, %v2839_v18  ;;  %3435 = vmatmul.msk.f32.vlgmr.msrb.gmra.mxu3 %vm1246_vm2, %v2876_v36 }
 0x6b2   :  { %v3555_v51 = vpop.eup %3554 }
 0x6b3   :  { %v3557_v0 = vpop.eup %3556  ;;  %v2854_v39 = vmul.f32 %v3555_v51, %v2836_v28  ;;  %v2863_v26 = vsub.f32 2.0, %v2855_v41  ;;  %3434 = vmatmul.msk.f32.vlgmr.msra.gmra.mxu1 %vm1246_vm2, %v2875_v8  ;;  %v3326_v8 = vld [vmem:[#allocation13 + $0x60] sm:$0xff] }
 0x6b4   :  { %v2853_v33 = vmul.f32 %v3557_v0, %v2833_v29  ;;  %3337 = vmatpush.msra.mxu3 %v3326_v8 }
 0x6b5   :  { %v2862_v10 = vsub.f32 2.0, %v2854_v39  ;;  %v2871_v44 = vmul.f32 %v3553_v15, %v2863_v26 }
 0x6b6   :  { %v2861_v45 = vsub.f32 2.0, %v2853_v33 }
 0x6b7   :  { %v2870_v34 = vmul.f32 %v3555_v51, %v2862_v10  ;;  %v2879_v61 = vmul.f32 %v4688_v31, %v2871_v44 }
 0x6b8   :  { %v2869_v16 = vmul.f32 %v3557_v0, %v2861_v45 }
 0x6b9   :  { %v2878_v6 = vmul.f32 %v4694_v35, %v2870_v34  ;;  %3438 = vmatmul.msk.f32.vlgmr.msrb.gmra.mxu2 %vm1246_vm2, %v2879_v61 }
 0x6ba   :  { %v2877_v23 = vmul.f32 %v4690_v13, %v2869_v16 }
 0x6bb   :  { %3437 = vmatmul.msk.f32.vlgmr.msrb.gmra.mxu1 %vm1246_vm2, %v2878_v6 }
 0x6bc   :  { %3436 = vmatmul.msk.f32.vlgmr.msra.gmra.mxu0 %vm1246_vm2, %v2877_v23 }
 0x71f   :  { %v2946_v5 = vpop.f32.mrf.mxu0 }
 0x720   :  { %v3064_v47 = vrot.slane %v2946_v5, 4 }
 0x728   :  { %v2900_v46 = vpop.f32.mrf.mxu1 }
 0x729   :  { %v3066_v42 = vrot.slane %v2900_v46, 4  ;;  %v2923_v50 = vpop.f32.mrf.mxu3  ;;  %v3065_v31 = vsel %vm338_vm1, %v3064_v47, %v2900_v46 }
 0x72a   :  { %v3078_v35 = vrot.slane %v2923_v50, 4  ;;  %v3071_v7 = vperm.slane %v3065_v31, %v3923_v43 }
 0x72b   :  { %v3067_v40 = vsel %vm338_vm1, %v2946_v5, %v3066_v42 }
 0x72c   :  { %v3075_v52 = vperm.slane %v3067_v40, %v3923_v43  ;;  %v3090_v48 = vrot.slane %v3071_v7, 4 }
 0x72e   :  { %v3102_v12 = vrot.slane %v3075_v52, 4 }
 0x730   :  { %v2969_v17 = vpop.f32.mrf.mxu1 }
 0x731   :  { %v3076_v13 = vrot.slane %v2969_v17, 4  ;;  %v3079_v54 = vsel %vm338_vm1, %v2969_v17, %v3078_v35 }
 0x732   :  { %v3087_v57 = vperm.slane %v3079_v54, %v3923_v43 }
 0x733   :  { %v3077_v58 = vsel %vm338_vm1, %v3076_v13, %v2923_v50 }
 0x734   :  { %v3083_v60 = vperm.slane %v3077_v58, %v3923_v43  ;;  %v3100_v53 = vrot.slane %v3087_v57, 4  ;;  %v3103_v21 = vsel %vm338_vm1, %v3087_v57, %v3102_v12  ;;  %v2992_v63 = vpop.f32.mrf.mxu3 }
 0x735   :  { %v3111_v3 = vperm.slane %v3103_v21, %v3933_v55  ;;  %v3122_v37 = vrot.slane %v2992_v63, 4 }
 0x736   :  { %v3088_v49 = vrot.slane %v3083_v60, 4  ;;  %v3091_v4 = vsel %vm338_vm1, %v3083_v60, %v3090_v48  ;;  %v3101_v19 = vsel %vm338_vm1, %v3100_v53, %v3075_v52 }
 0x737   :  { %v3099_v59 = vperm.slane %v3091_v4, %v3933_v55  ;;  %v3107_v9 = vperm.slane %v3101_v19, %v3933_v55  ;;  %v3118_v24 = vrot.slane %v3111_v3, 4 }
 0x738   :  { %v3089_v25 = vsel %vm338_vm1, %v3088_v49, %v3071_v7  ;;  %v3038_v30 = vpop.f32.mrf.mxu1 }
 0x739   :  { %v3095_v56 = vperm.slane %v3089_v25, %v3933_v55  ;;  %v3114_v38 = vrot.slane %v3099_v59, 4  ;;  %v3116_v11 = vrot.slane %v3107_v9, 4  ;;  %v3119_v18 = vsel %vm338_vm1, 0.0, %v3118_v24  ;;  %v3015_v2 = vpop.f32.mrf.mxu0 }
 0x73a   :  { %v3187_v14 = vsel %vm338_vm1, %v3118_v24, %v3107_v9  ;;  %v3192_v28 = vrot.slane %v3119_v18, 4  ;;  %v3120_v29 = vrot.slane %v3038_v30, 4  ;;  %v3123_v1 = vsel %vm338_vm1, %v3038_v30, %v3122_v37 }
 0x73b   :  { %v3112_v32 = vrot.slane %v3095_v56, 4  ;;  %v3115_v62 = vsel %vm338_vm1, 0.0, %v3114_v38  ;;  %v3117_v36 = vsel %vm338_vm1, 0.0, %v3116_v11  ;;  %v4822_v15 = vperm.slane %v3187_v14, %v3923_v43 }
 0x73c   :  { %v3181_v41 = vrot.slane %v3115_v62, 4  ;;  %v3121_v51 = vsel %vm338_vm1, %v3120_v29, %v2992_v63  ;;  %v3131_v0 = vperm.slane %v3123_v1, %v3923_v43  ;;  %v3134_v39 = vrot.slane %v3015_v2, 4  ;;  %v3061_v26 = vpop.f32.mrf.mxu2 }
 0x73d   :  { %v3127_v33 = vperm.slane %v3121_v51, %v3923_v43  ;;  %v3132_v10 = vrot.slane %v3061_v26, 4  ;;  %v3113_v44 = vsel %vm338_vm1, 0.0, %v3112_v32  ;;  %v3176_v45 = vsel %vm338_vm1, %v3114_v38, %v3095_v56 }
 0x73e   :  { %v3158_v34 = vrot.slane %v3131_v0, 4  ;;  %v3135_v61 = vsel %vm338_vm1, %v3061_v26, %v3134_v39  ;;  %v3180_v16 = vperm.slane %v3176_v45, %v3923_v43  ;;  %v3182_v6 = vsel %vm338_vm1, %v3181_v41, %v3113_v44 }
 0x73f   :  { %v3146_v23 = vrot.slane %v3127_v33, 4  ;;  %v3133_v5 = vsel %vm338_vm1, %v3132_v10, %v3015_v2  ;;  %v3143_v46 = vperm.slane %v3135_v61, %v3923_v43  ;;  %v3186_v42 = vperm.slane %v3182_v6, %v3923_v43 }
 0x740   :  { %v3139_v47 = vperm.slane %v3133_v5, %v3923_v43  ;;  %v3193_v40 = vsel %vm338_vm1, %v3192_v28, %v3117_v36  ;;  %v3200_v50 = vrot.slane %v3180_v16, 4  ;;  %v3212_v31 = vrot.slane %v4822_v15, 4 }
 0x741   :  { %v3156_v52 = vrot.slane %v3143_v46, 4  ;;  %v3159_v35 = vsel %vm338_vm1, %v3143_v46, %v3158_v34  ;;  %v3197_v7 = vperm.slane %v3193_v40, %v3923_v43  ;;  %v3198_v17 = vrot.slane %v3186_v42, 4 }
 0x742   :  { %v3144_v13 = vrot.slane %v3139_v47, 4  ;;  %v3147_v54 = vsel %vm338_vm1, %v3139_v47, %v3146_v23  ;;  %v3167_v12 = vperm.slane %v3159_v35, %v3933_v55  ;;  %v3201_v57 = vsel %vm338_vm1, %v3186_v42, %v3200_v50 }
 0x743   :  { %v3155_v58 = vperm.slane %v3147_v54, %v3933_v55  ;;  %v3157_v48 = vsel %vm338_vm1, %v3156_v52, %v3131_v0  ;;  %v3209_v60 = vperm.slane %v3201_v57, %v3933_v55  ;;  %v3213_v53 = vsel %vm338_vm1, %v3197_v7, %v3212_v31  ;;  %v3323_v54 = vld [vmem:[#allocation13 + $0x48] sm:$0xff]  ;;  %v3321_v57 = vld [vmem:[#allocation13 + $0x38] sm:$0xff] }
 0x744   :  { %v3145_v21 = vsel %vm338_vm1, %v3144_v13, %v3127_v33  ;;  %v3163_v63 = vperm.slane %v3157_v48, %v3933_v55  ;;  %v3174_v3 = vrot.slane %v3167_v12, 4  ;;  %v3221_v49 = vperm.slane %v3213_v53, %v3933_v55  ;;  %v3324_v13 = vld [vmem:[#allocation13 + $0x50] sm:$0xff]  ;;  %v3322_v12 = vld [vmem:[#allocation13 + $0x40] sm:$0xff]  ;;  %v3319_v48 = vld [vmem:[#allocation13 + $0x28] sm:$0xff] }
 0x745   :  { %v3151_v4 = vperm.slane %v3145_v21, %v3933_v55  ;;  %v3170_v19 = vrot.slane %v3155_v58, 4  ;;  %v3228_v37 = vrot.slane %v3209_v60, 4  ;;  %v3199_v59 = vsel %vm338_vm1, %v3198_v17, %v3180_v16  ;;  %v3320_v58 = vld [vmem:[#allocation13 + $0x30] sm:$0xff]  ;;  %v3317_v53 = vld [vmem:[#allocation13 + $0x18] sm:$0xff] }
 0x746   :  { %v3172_v9 = vrot.slane %v3163_v63, 4  ;;  %v3175_v24 = vsel %vm338_vm1, 0.0, %v3174_v3  ;;  %v3241_v22 = vsel %vm338_vm1, %v3174_v3, %v3163_v63  ;;  %v3226_v27 = vrot.slane %v3221_v49, 4  ;;  %v3316_v21 = vld [vmem:[#allocation13 + $0x10] sm:$0xff]  ;;  %v3315_v63 = vld [vmem:[#allocation13 + $0x8] sm:$0xff]  ;;  %v3314_v3 = vld [vmem:[#allocation13] sm:$0xff] }
 0x747   :  { %v3168_v25 = vrot.slane %v3151_v4, 4  ;;  %v3171_v30 = vsel %vm338_vm1, 0.0, %v3170_v19  ;;  %v3245_v56 = vperm.slane %v3241_v22, %v3923_v43  ;;  %v3246_v38 = vrot.slane %v3175_v24, 4 }
 0x748   :  { %v3173_v11 = vsel %vm338_vm1, 0.0, %v3172_v9  ;;  %v3235_v18 = vrot.slane %v3171_v30, 4  ;;  %v3227_v2 = vsel %vm338_vm1, %v3226_v27, %v3209_v60  ;;  %v3229_v20 = vsel %vm338_vm1, %v3221_v49, %v3228_v37  ;;  %v3318_v60 = vld [vmem:[#allocation13 + $0x20] sm:$0xff] }
 0x749   :  { %3294 = vrot.lane.b32.xlu1 %v3227_v2, %s3775_s16  ;;  %3302 = vrot.lane.b32.xlu0 %v3229_v20, %s3776_s4  ;;  %v3205_v14 = vperm.slane %v3199_v59, %v3933_v55  ;;  %v3210_v28 = vrot.slane %v3197_v7, 4  ;;  %v3169_v29 = vsel %vm338_vm1, 0.0, %v3168_v25  ;;  %v3230_v1 = vsel %vm338_vm1, %v3170_v19, %v3151_v4 }
 0x74a   :  { %v3234_v32 = vperm.slane %v3230_v1, %v3923_v43  ;;  %v3236_v62 = vsel %vm338_vm1, %v3235_v18, %v3169_v29  ;;  %v3247_v36 = vsel %vm338_vm1, %v3246_v38, %v3173_v11  ;;  %v3266_v8 = vrot.slane %v3245_v56, 4  ;;  %v3493_v38 = vld [vmem:[%s4915_s10] ss:$0 sm:$0xff] }
 0x74b   :  { %v3211_v41 = vsel %vm338_vm1, %v3210_v28, %v4822_v15  ;;  %v3224_v51 = vrot.slane %v3205_v14, 4  ;;  %v3240_v0 = vperm.slane %v3236_v62, %v3923_v43  ;;  %v3251_v39 = vperm.slane %v3247_v36, %v3923_v43 }
 0x74c   :  { %v3217_v26 = vperm.slane %v3211_v41, %v3933_v55  ;;  %v3254_v33 = vrot.slane %v3234_v32, 4 }
 0x74d   :  { %v3267_v10 = vsel %vm338_vm1, %v3251_v39, %v3266_v8  ;;  %v3252_v44 = vrot.slane %v3240_v0, 4  ;;  %v3264_v45 = vrot.slane %v3251_v39, 4 }
 0x74e   :  { %v3222_v34 = vrot.slane %v3217_v26, 4  ;;  %v3225_v61 = vsel %vm338_vm1, %v3217_v26, %v3224_v51  ;;  %v3255_v16 = vsel %vm338_vm1, %v3240_v0, %v3254_v33  ;;  %v3275_v6 = vperm.slane %v3267_v10, %v3933_v55 }
 0x74f   :  { %3286 = vrot.lane.b32.xlu2 %v3225_v61, %s3774_s15  ;;  %v3263_v15 = vperm.slane %v3255_v16, %v3933_v55  ;;  %v3253_v43 = vsel %vm338_vm1, %v3252_v44, %v3234_v32  ;;  %v3265_v23 = vsel %vm338_vm1, %v3264_v45, %v3245_v56 }
 0x750   :  { %v3280_v5 = vrot.slane %v3275_v6, 4  ;;  %v3259_v46 = vperm.slane %v3253_v43, %v3933_v55  ;;  %v3271_v42 = vperm.slane %v3265_v23, %v3933_v55  ;;  %v3223_v47 = vsel %vm338_vm1, %v3222_v34, %v3205_v14  ;;  %v3325_v55 = vld [vmem:[#allocation13 + $0x58] sm:$0xff] }
 0x751   :  { %v3282_v40 = vrot.slane %v3263_v15, 4  ;;  %3338 = vmatpush.msra.mxu3 %v3325_v55 }
 0x752   :  { %v3281_v50 = vsel %vm338_vm1, %v3280_v5, %v3263_v15  ;;  %v3276_v31 = vrot.slane %v3271_v42, 4  ;;  %v3278_v52 = vrot.slane %v3259_v46, 4 }
 0x753   :  { %3296 = vrot.lane.b32.xlu0 %v3281_v50, %s3775_s16  ;;  %v3283_v35 = vsel %vm338_vm1, %v3275_v6, %v3282_v40  ;;  %3339 = vmatpush.msra.mxu3 %v3324_v13 }
 0x754   :  { %3304 = vrot.lane.b32.xlu1 %v3283_v35, %s3776_s4  ;;  %v3279_v7 = vsel %vm338_vm1, %v3271_v42, %v3278_v52  ;;  %v3277_v17 = vsel %vm338_vm1, %v3276_v31, %v3259_v46 }
 0x755   :  { %3340 = vmatpush.msra.mxu3 %v3323_v54 }
 0x757   :  { %3288 = vrot.lane.b32.xlu2 %v3279_v7, %s3774_s15  ;;  %3341 = vmatpush.msra.mxu3 %v3322_v12 }
 0x759   :  { %3342 = vmatpush.msra.mxu3 %v3321_v57 }
 0x75b   :  { %3343 = vmatpush.msra.mxu3 %v3320_v58 }
 0x75d   :  { %3344 = vmatpush.msra.mxu3 %v3319_v48 }
 0x75f   :  { %3345 = vmatpush.msra.mxu3 %v3318_v60 }
 0x761   :  { %3346 = vmatpush.msra.mxu3 %v3317_v53 }
 0x763   :  { %3347 = vmatpush.msra.mxu3 %v3316_v21 }
 0x765   :  { %3348 = vmatpush.msra.mxu3 %v3315_v63 }
 0x767   :  { %3349 = vmatpush.msra.mxu3 %v3314_v3 }
 0x7a9   :  { %v3287_v49 = vpop.permute.xlu2 %3286 }
 0x7aa   :  { %v3308_v4 = vsel %vm167_vm0, %v3223_v47, %v3287_v49 }
 0x7b1   :  { %v3289_v24 = vpop.permute.xlu2 %3288 }
 0x7b2   :  { %v3309_v22 = vsel %vm167_vm0, %v3277_v17, %v3289_v24 }
 0x7bb   :  { %v3295_v19 = vpop.permute.xlu1 %3294  ;;  %v3303_v37 = vpop.permute.xlu0 %3302 }
 0x7bc   :  { %v3310_v59 = vsel %vm1789_vm3, %v3308_v4, %v3295_v19 }
 0x7bd   :  { %v3312_v9 = vsel %vm1792_vm4, %v3310_v59, %v3303_v37 }
 0x7be   :  { %3350 = vmatmul.f32.vlgmr.msra.gmra.mxu3 %v3312_v9 }
 0x7c5   :  { %v3297_v27 = vpop.permute.xlu0 %3296 }
 0x7c6   :  { %v3311_v25 = vsel %vm1789_vm3, %v3309_v22, %v3297_v27  ;;  %v3305_v30 = vpop.permute.xlu1 %3304 }
 0x7c7   :  { %v3313_v56 = vsel %vm1792_vm4, %v3311_v25, %v3305_v30 }
 0x7c8   :  { %3353 = vmatmul.f32.gmra.mxu3 %v3313_v56 }
 0x841   :  { %v3351_v11 = vpop.f32.mrf.mxu3 }
 0x842   :  { %v3352_v18 = vadd.f32 %v3493_v38, %v3351_v11 }
 0x844   :  { %3357 = vst [vmem:[#allocation14] sm:$0xff] %v3352_v18 }
 0x84b   :  { %v3354_v2 = vpop.f32.mrf.mxu3 }
 0x84c   :  { %v3355_v20 = vadd.f32 %v3493_v38, %v3354_v2 }
 0x84e   :  { %3358 = vst [vmem:[#allocation14 + $0x8] sm:$0xff] %v3355_v20 }
 0x84f   :  { %3371 = dma.vmem_to_hbm [thread:$0]  %s3364_s22, 256, %s3366_s0, [#allocation4], %s3762_s25, %s3762_s25, %s3763_s26  }
 0x850   :  { %3759 = dma.done.wait [#allocation4], 256  }
 0x851   :  { %3760 = vsyncadd [#allocation4], 4294967040 }
 0x852   :  { %3376 = vsyncpa [#allocation3], 1 }
 0x853   :  { %3377 = vsyncpa [#allocation6], 1 }
 0x854   :  { %3378 = vsyncpa [#allocation9], 1 }
 0x855   :  { %3379 = vsyncpa [#allocation12], 1 }
 0x856   :  { %3380 = vsyncpa [#allocation4], 1 }

</bundles_post_ra>
